<compile_context>
chip_gen: v5e
topology: v5e:2x2
jax: 0.10.0
libtpu: 0.0.40
codegen_flags: <defaults>
</compile_context>

<pallas_src>
import functools

import jax
import jax.numpy as jnp
from jax import lax
from jax.experimental import pallas as pl
from jax.experimental.pallas import tpu as pltpu  # noqa: F401  (TPU backend)


# ----------------------------------------------------------------------------
# Fused Critic kernel: both LSTM stacks + head in one kernel invocation.
# ----------------------------------------------------------------------------
def _make_critic_kernel(n_layers1, n_layers2, sep, T, Bp):
    """Builds a kernel closure over the static configuration.

    Kernel ref order:
      x2d_ref                                  (T*Bp, D)   time-major, flattened
      [w_ih, w_hh, b] * n_layers1              stack 1 weights
      [w_ih, w_hh, b] * n_layers2              stack 2 weights
      w1t_ref (1, H1), w2t_ref (1, H2), bout_ref (1, 1)
      out_ref (Bp, 1)
    """

    def run_stack(seq2d, layers, steps):
        # seq2d: (steps*Bp, D_in) time-major flattened input sequence (a value).
        cur = seq2d
        h = None
        n = len(layers)
        for li, (wih_ref, whh_ref, b_ref) in enumerate(layers):
            H = whh_ref.shape[-1] // 4
            wih = wih_ref[...]                     # (D_in, 4H) — load once
            whh = whh_ref[...]                     # (H,    4H) — load once
            # Input projection for ALL timesteps at once (off the serial path).
            xg = (
                jnp.dot(cur, wih, preferred_element_type=jnp.float32)
                + b_ref[...]                       # (1, 4H) broadcast
            )                                      # (steps*Bp, 4H)

            h = jnp.zeros((Bp, H), jnp.float32)
            c = jnp.zeros((Bp, H), jnp.float32)
            outs = []
            # Fully unrolled time loop (steps is small & static).
            for t in range(steps):
                gates = xg[t * Bp:(t + 1) * Bp, :] + jnp.dot(
                    h, whh, preferred_element_type=jnp.float32
                )                                  # (Bp, 4H)
                i_g = jax.nn.sigmoid(gates[:, 0 * H:1 * H])
                f_g = jax.nn.sigmoid(gates[:, 1 * H:2 * H])
                g_g = jnp.tanh(gates[:, 2 * H:3 * H])
                o_g = jax.nn.sigmoid(gates[:, 3 * H:4 * H])
                c = f_g * c + i_g * g_g
                h = o_g * jnp.tanh(c)
                if li < n - 1:                     # only keep sequence if a
                    outs.append(h)                 # further layer consumes it
            if li < n - 1:
                cur = jnp.concatenate(outs, axis=0)   # (steps*Bp, H)
        return h                                   # last hidden state (Bp, H)

    def kernel(*refs):
        x2d_ref = refs[0]
        pos = 1
        layers1 = [tuple(refs[pos + 3 * i: pos + 3 * i + 3])
                   for i in range(n_layers1)]
        pos += 3 * n_layers1
        layers2 = [tuple(refs[pos + 3 * i: pos + 3 * i + 3])
                   for i in range(n_layers2)]
        pos += 3 * n_layers2
        w1t_ref, w2t_ref, bout_ref, out_ref = refs[pos:pos + 4]

        # Stack 1 consumes the first `sep` timesteps, stack 2 the full sequence.
        h1_last = run_stack(x2d_ref[:sep * Bp, :], layers1, sep)
        h2_last = run_stack(x2d_ref[...], layers2, T)

        # Linear head: concat(h1, h2) @ W + b, done as VPU mul + lane reduction.
        out_ref[...] = (
            jnp.sum(h1_last * w1t_ref[...], axis=-1, keepdims=True)
            + jnp.sum(h2_last * w2t_ref[...], axis=-1, keepdims=True)
            + bout_ref[...]
        )

    return kernel


def critic_forward(params, data, sep, hidden_size, num_layers):
    """Fused Critic forward. data: (B, T, D) -> (B, 1)."""
    B, T, D = data.shape
    H1, H2 = hidden_size
    n1, n2 = num_layers

    # Pad batch to a full sublane group (8) for unmasked vreg ops/stores.
    Bp = ((B + 7) // 8) * 8
    if Bp != B:
        data = jnp.pad(data, ((0, Bp - B), (0, 0), (0, 0)))

    # Time-major, flattened to 2D so per-timestep access is a static sublane slice.
    x2d = jnp.transpose(data, (1, 0, 2)).reshape(T * Bp, D)

    args = [x2d]
    for (w_ih, w_hh, b) in params["lstm1"]:
        args += [w_ih, w_hh, b.reshape(1, -1)]
    for (w_ih, w_hh, b) in params["lstm2"]:
        args += [w_ih, w_hh, b.reshape(1, -1)]
    w1t = params["w_out"][:H1, 0].reshape(1, H1)
    w2t = params["w_out"][H1:, 0].reshape(1, H2)
    bout = params["b_out"].reshape(1, 1)
    args += [w1t, w2t, bout]

    kernel = _make_critic_kernel(n1, n2, sep, T, Bp)
    out = pl.pallas_call(
        kernel,
        out_shape=jax.ShapeDtypeStruct((Bp, 1), jnp.float32),
    )(*args)
    return out[:B]


# ----------------------------------------------------------------------------
# Parameter construction (deterministic, synthetic; mirrors torch.nn.LSTM shapes)
# ----------------------------------------------------------------------------
def make_lstm_params(key, input_dim, hidden, num_layers):
    params = []
    scale = 1.0 / jnp.sqrt(jnp.float32(hidden))
    for layer in range(num_layers):
        d = input_dim if layer == 0 else hidden
        key, k1, k2, k3, k4 = jax.random.split(key, 5)
        w_ih = jax.random.uniform(k1, (d, 4 * hidden), jnp.float32, -scale, scale)
        w_hh = jax.random.uniform(k2, (hidden, 4 * hidden), jnp.float32, -scale, scale)
        b_ih = jax.random.uniform(k3, (4 * hidden,), jnp.float32, -scale, scale)
        b_hh = jax.random.uniform(k4, (4 * hidden,), jnp.float32, -scale, scale)
        params.append((w_ih, w_hh, b_ih + b_hh))
    return params, key


def make_critic_params(key, input_size, hidden_size, num_layers):
    p1, key = make_lstm_params(key, input_size[0], hidden_size[0], num_layers[0])
    p2, key = make_lstm_params(key, input_size[1], hidden_size[1], num_layers[1])
    key, k1, k2 = jax.random.split(key, 3)
    fan_in = hidden_size[0] + hidden_size[1]
    s = 1.0 / jnp.sqrt(jnp.float32(fan_in))
    w_out = jax.random.uniform(k1, (fan_in, 1), jnp.float32, -s, s)
    b_out = jax.random.uniform(k2, (1,), jnp.float32, -s, s)
    return {"lstm1": p1, "lstm2": p2, "w_out": w_out, "b_out": b_out}


# ----------------------------------------------------------------------------
# Pure-JAX reference (for correctness check)
# ----------------------------------------------------------------------------
def lstm_layer_ref(x, w_ih, w_hh, b):
    B, T, D = x.shape
    H = w_hh.shape[0]

    def step(carry, x_t):
        h, c = carry
        gates = x_t @ w_ih + h @ w_hh + b
        i = jax.nn.sigmoid(gates[:, :H])
        f = jax.nn.sigmoid(gates[:, H:2 * H])
        g = jnp.tanh(gates[:, 2 * H:3 * H])
        o = jax.nn.sigmoid(gates[:, 3 * H:])
        c = f * c + i * g
        h = o * jnp.tanh(c)
        return (h, c), h

    init = (jnp.zeros((B, H), jnp.float32), jnp.zeros((B, H), jnp.float32))
    _, hs = lax.scan(step, init, jnp.swapaxes(x, 0, 1))
    return jnp.swapaxes(hs, 0, 1)


def critic_forward_ref(params, data, sep, hidden_size):
    r1 = data[:, :sep, :]
    for (w_ih, w_hh, b) in params["lstm1"]:
        r1 = lstm_layer_ref(r1, w_ih, w_hh, b)
    r2 = data
    for (w_ih, w_hh, b) in params["lstm2"]:
        r2 = lstm_layer_ref(r2, w_ih, w_hh, b)
    cat = jnp.concatenate([r1[:, -1, :], r2[:, -1, :]], axis=1)
    return cat @ params["w_out"] + params["b_out"]


# ----------------------------------------------------------------------------
if __name__ == "__main__":
    # Small, module-consistent shapes.
    B, T, D = 2, 8, 16
    hidden_size = (32, 32)
    input_size = (D, D)          # both LSTMs consume the same feature dim
    num_layers = (1, 1)
    sep = 4

    key = jax.random.PRNGKey(0)
    key, k_data = jax.random.split(key)
    data = jax.random.normal(k_data, (B, T, D), jnp.float32)

    params = make_critic_params(key, input_size, hidden_size, num_layers)

    fwd = jax.jit(functools.partial(
        critic_forward, sep=sep, hidden_size=hidden_size, num_layers=num_layers))
    out = fwd(params, data)
    jax.block_until_ready(out)

    ref = critic_forward_ref(params, data, sep, hidden_size)
    assert out.shape == (B, 1), out.shape
    assert jnp.allclose(out, ref, atol=1e-4, rtol=1e-4), (out, ref)

    print("KERNEL_OK")
</pallas_src>

<mosaic_0001>
module attributes {stable_mosaic.version = 11 : i64} {
  func.func @kernel(%arg0: memref<64x16xf32, #tpu.memory_space<vmem>>, %arg1: memref<16x128xf32, #tpu.memory_space<vmem>>, %arg2: memref<32x128xf32, #tpu.memory_space<vmem>>, %arg3: memref<1x128xf32, #tpu.memory_space<vmem>>, %arg4: memref<16x128xf32, #tpu.memory_space<vmem>>, %arg5: memref<32x128xf32, #tpu.memory_space<vmem>>, %arg6: memref<1x128xf32, #tpu.memory_space<vmem>>, %arg7: memref<1x32xf32, #tpu.memory_space<vmem>>, %arg8: memref<1x32xf32, #tpu.memory_space<vmem>>, %arg9: memref<1x1xf32, #tpu.memory_space<vmem>>, %arg10: memref<8x1xf32, #tpu.memory_space<vmem>>) attributes {dimension_semantics = [], scalar_prefetch = 0 : i64, scratch_operands = 0 : i64, tpu.core_type = #tpu.core_type<tc>} {
    %c0 = arith.constant 0 : index
    %c0_0 = arith.constant 0 : index
    %0 = vector.load %arg0[%c0, %c0_0] : memref<64x16xf32, #tpu.memory_space<vmem>>, vector<32x16xf32>
    %c0_1 = arith.constant 0 : index
    %c0_2 = arith.constant 0 : index
    %1 = vector.load %arg1[%c0_1, %c0_2] : memref<16x128xf32, #tpu.memory_space<vmem>>, vector<16x128xf32>
    %c0_3 = arith.constant 0 : index
    %c0_4 = arith.constant 0 : index
    %2 = vector.load %arg2[%c0_3, %c0_4] : memref<32x128xf32, #tpu.memory_space<vmem>>, vector<32x128xf32>
    %cst = arith.constant dense<0.000000e+00> : vector<32x128xf32>
    %3 = tpu.matmul %0, %1, %cst {dimension_numbers = #tpu.dot_dimension_numbers<[1], [0], [0], [1], [0, 0, 1, 1], [], []>} : vector<32x16xf32>, vector<16x128xf32>, vector<32x128xf32> -> vector<32x128xf32>
    %c0_5 = arith.constant 0 : index
    %c0_6 = arith.constant 0 : index
    %4 = vector.load %arg3[%c0_5, %c0_6] : memref<1x128xf32, #tpu.memory_space<vmem>>, vector<1x128xf32>
    %5 = vector.broadcast %4 : vector<1x128xf32> to vector<32x128xf32>
    %6 = arith.addf %3, %5 : vector<32x128xf32>
    %cst_7 = arith.constant 0.000000e+00 : f32
    %7 = vector.broadcast %cst_7 : f32 to vector<8x32xf32>
    %cst_8 = arith.constant 0.000000e+00 : f32
    %8 = vector.broadcast %cst_8 : f32 to vector<8x32xf32>
    %9 = vector.extract_strided_slice %6 {offsets = [0, 0], sizes = [8, 128], strides = [1, 1]} : vector<32x128xf32> to vector<8x128xf32>
    %cst_9 = arith.constant dense<0.000000e+00> : vector<8x128xf32>
    %10 = tpu.matmul %7, %2, %cst_9 {dimension_numbers = #tpu.dot_dimension_numbers<[1], [0], [0], [1], [0, 0, 1, 1], [], []>} : vector<8x32xf32>, vector<32x128xf32>, vector<8x128xf32> -> vector<8x128xf32>
    %11 = arith.addf %9, %10 : vector<8x128xf32>
    %12 = vector.extract_strided_slice %11 {offsets = [0, 0], sizes = [8, 32], strides = [1, 1]} : vector<8x128xf32> to vector<8x32xf32>
    %13 = arith.negf %12 : vector<8x32xf32>
    %14 = math.exp %13 : vector<8x32xf32>
    %cst_10 = arith.constant 1.000000e+00 : f32
    %15 = vector.broadcast %cst_10 : f32 to vector<8x32xf32>
    %16 = arith.addf %15, %14 : vector<8x32xf32>
    %17 = arith.divf %15, %16 : vector<8x32xf32>
    %18 = vector.extract_strided_slice %11 {offsets = [0, 32], sizes = [8, 32], strides = [1, 1]} : vector<8x128xf32> to vector<8x32xf32>
    %19 = arith.negf %18 : vector<8x32xf32>
    %20 = math.exp %19 : vector<8x32xf32>
    %cst_11 = arith.constant 1.000000e+00 : f32
    %21 = vector.broadcast %cst_11 : f32 to vector<8x32xf32>
    %22 = arith.addf %21, %20 : vector<8x32xf32>
    %23 = arith.divf %21, %22 : vector<8x32xf32>
    %24 = vector.extract_strided_slice %11 {offsets = [0, 64], sizes = [8, 32], strides = [1, 1]} : vector<8x128xf32> to vector<8x32xf32>
    %25 = math.tanh %24 : vector<8x32xf32>
    %26 = vector.extract_strided_slice %11 {offsets = [0, 96], sizes = [8, 32], strides = [1, 1]} : vector<8x128xf32> to vector<8x32xf32>
    %27 = arith.negf %26 : vector<8x32xf32>
    %28 = math.exp %27 : vector<8x32xf32>
    %cst_12 = arith.constant 1.000000e+00 : f32
    %29 = vector.broadcast %cst_12 : f32 to vector<8x32xf32>
    %30 = arith.addf %29, %28 : vector<8x32xf32>
    %31 = arith.divf %29, %30 : vector<8x32xf32>
    %32 = arith.mulf %23, %8 : vector<8x32xf32>
    %33 = arith.mulf %17, %25 : vector<8x32xf32>
    %34 = arith.addf %32, %33 : vector<8x32xf32>
    %35 = math.tanh %34 : vector<8x32xf32>
    %36 = arith.mulf %31, %35 : vector<8x32xf32>
    %37 = vector.extract_strided_slice %6 {offsets = [8, 0], sizes = [8, 128], strides = [1, 1]} : vector<32x128xf32> to vector<8x128xf32>
    %cst_13 = arith.constant dense<0.000000e+00> : vector<8x128xf32>
    %38 = tpu.matmul %36, %2, %cst_13 {dimension_numbers = #tpu.dot_dimension_numbers<[1], [0], [0], [1], [0, 0, 1, 1], [], []>} : vector<8x32xf32>, vector<32x128xf32>, vector<8x128xf32> -> vector<8x128xf32>
    %39 = arith.addf %37, %38 : vector<8x128xf32>
    %40 = vector.extract_strided_slice %39 {offsets = [0, 0], sizes = [8, 32], strides = [1, 1]} : vector<8x128xf32> to vector<8x32xf32>
    %41 = arith.negf %40 : vector<8x32xf32>
    %42 = math.exp %41 : vector<8x32xf32>
    %cst_14 = arith.constant 1.000000e+00 : f32
    %43 = vector.broadcast %cst_14 : f32 to vector<8x32xf32>
    %44 = arith.addf %43, %42 : vector<8x32xf32>
    %45 = arith.divf %43, %44 : vector<8x32xf32>
    %46 = vector.extract_strided_slice %39 {offsets = [0, 32], sizes = [8, 32], strides = [1, 1]} : vector<8x128xf32> to vector<8x32xf32>
    %47 = arith.negf %46 : vector<8x32xf32>
    %48 = math.exp %47 : vector<8x32xf32>
    %cst_15 = arith.constant 1.000000e+00 : f32
    %49 = vector.broadcast %cst_15 : f32 to vector<8x32xf32>
    %50 = arith.addf %49, %48 : vector<8x32xf32>
    %51 = arith.divf %49, %50 : vector<8x32xf32>
    %52 = vector.extract_strided_slice %39 {offsets = [0, 64], sizes = [8, 32], strides = [1, 1]} : vector<8x128xf32> to vector<8x32xf32>
    %53 = math.tanh %52 : vector<8x32xf32>
    %54 = vector.extract_strided_slice %39 {offsets = [0, 96], sizes = [8, 32], strides = [1, 1]} : vector<8x128xf32> to vector<8x32xf32>
    %55 = arith.negf %54 : vector<8x32xf32>
    %56 = math.exp %55 : vector<8x32xf32>
    %cst_16 = arith.constant 1.000000e+00 : f32
    %57 = vector.broadcast %cst_16 : f32 to vector<8x32xf32>
    %58 = arith.addf %57, %56 : vector<8x32xf32>
    %59 = arith.divf %57, %58 : vector<8x32xf32>
    %60 = arith.mulf %51, %34 : vector<8x32xf32>
    %61 = arith.mulf %45, %53 : vector<8x32xf32>
    %62 = arith.addf %60, %61 : vector<8x32xf32>
    %63 = math.tanh %62 : vector<8x32xf32>
    %64 = arith.mulf %59, %63 : vector<8x32xf32>
    %65 = vector.extract_strided_slice %6 {offsets = [16, 0], sizes = [8, 128], strides = [1, 1]} : vector<32x128xf32> to vector<8x128xf32>
    %cst_17 = arith.constant dense<0.000000e+00> : vector<8x128xf32>
    %66 = tpu.matmul %64, %2, %cst_17 {dimension_numbers = #tpu.dot_dimension_numbers<[1], [0], [0], [1], [0, 0, 1, 1], [], []>} : vector<8x32xf32>, vector<32x128xf32>, vector<8x128xf32> -> vector<8x128xf32>
    %67 = arith.addf %65, %66 : vector<8x128xf32>
    %68 = vector.extract_strided_slice %67 {offsets = [0, 0], sizes = [8, 32], strides = [1, 1]} : vector<8x128xf32> to vector<8x32xf32>
    %69 = arith.negf %68 : vector<8x32xf32>
    %70 = math.exp %69 : vector<8x32xf32>
    %cst_18 = arith.constant 1.000000e+00 : f32
    %71 = vector.broadcast %cst_18 : f32 to vector<8x32xf32>
    %72 = arith.addf %71, %70 : vector<8x32xf32>
    %73 = arith.divf %71, %72 : vector<8x32xf32>
    %74 = vector.extract_strided_slice %67 {offsets = [0, 32], sizes = [8, 32], strides = [1, 1]} : vector<8x128xf32> to vector<8x32xf32>
    %75 = arith.negf %74 : vector<8x32xf32>
    %76 = math.exp %75 : vector<8x32xf32>
    %cst_19 = arith.constant 1.000000e+00 : f32
    %77 = vector.broadcast %cst_19 : f32 to vector<8x32xf32>
    %78 = arith.addf %77, %76 : vector<8x32xf32>
    %79 = arith.divf %77, %78 : vector<8x32xf32>
    %80 = vector.extract_strided_slice %67 {offsets = [0, 64], sizes = [8, 32], strides = [1, 1]} : vector<8x128xf32> to vector<8x32xf32>
    %81 = math.tanh %80 : vector<8x32xf32>
    %82 = vector.extract_strided_slice %67 {offsets = [0, 96], sizes = [8, 32], strides = [1, 1]} : vector<8x128xf32> to vector<8x32xf32>
    %83 = arith.negf %82 : vector<8x32xf32>
    %84 = math.exp %83 : vector<8x32xf32>
    %cst_20 = arith.constant 1.000000e+00 : f32
    %85 = vector.broadcast %cst_20 : f32 to vector<8x32xf32>
    %86 = arith.addf %85, %84 : vector<8x32xf32>
    %87 = arith.divf %85, %86 : vector<8x32xf32>
    %88 = arith.mulf %79, %62 : vector<8x32xf32>
    %89 = arith.mulf %73, %81 : vector<8x32xf32>
    %90 = arith.addf %88, %89 : vector<8x32xf32>
    %91 = math.tanh %90 : vector<8x32xf32>
    %92 = arith.mulf %87, %91 : vector<8x32xf32>
    %93 = vector.extract_strided_slice %6 {offsets = [24, 0], sizes = [8, 128], strides = [1, 1]} : vector<32x128xf32> to vector<8x128xf32>
    %cst_21 = arith.constant dense<0.000000e+00> : vector<8x128xf32>
    %94 = tpu.matmul %92, %2, %cst_21 {dimension_numbers = #tpu.dot_dimension_numbers<[1], [0], [0], [1], [0, 0, 1, 1], [], []>} : vector<8x32xf32>, vector<32x128xf32>, vector<8x128xf32> -> vector<8x128xf32>
    %95 = arith.addf %93, %94 : vector<8x128xf32>
    %96 = vector.extract_strided_slice %95 {offsets = [0, 0], sizes = [8, 32], strides = [1, 1]} : vector<8x128xf32> to vector<8x32xf32>
    %97 = arith.negf %96 : vector<8x32xf32>
    %98 = math.exp %97 : vector<8x32xf32>
    %cst_22 = arith.constant 1.000000e+00 : f32
    %99 = vector.broadcast %cst_22 : f32 to vector<8x32xf32>
    %100 = arith.addf %99, %98 : vector<8x32xf32>
    %101 = arith.divf %99, %100 : vector<8x32xf32>
    %102 = vector.extract_strided_slice %95 {offsets = [0, 32], sizes = [8, 32], strides = [1, 1]} : vector<8x128xf32> to vector<8x32xf32>
    %103 = arith.negf %102 : vector<8x32xf32>
    %104 = math.exp %103 : vector<8x32xf32>
    %cst_23 = arith.constant 1.000000e+00 : f32
    %105 = vector.broadcast %cst_23 : f32 to vector<8x32xf32>
    %106 = arith.addf %105, %104 : vector<8x32xf32>
    %107 = arith.divf %105, %106 : vector<8x32xf32>
    %108 = vector.extract_strided_slice %95 {offsets = [0, 64], sizes = [8, 32], strides = [1, 1]} : vector<8x128xf32> to vector<8x32xf32>
    %109 = math.tanh %108 : vector<8x32xf32>
    %110 = vector.extract_strided_slice %95 {offsets = [0, 96], sizes = [8, 32], strides = [1, 1]} : vector<8x128xf32> to vector<8x32xf32>
    %111 = arith.negf %110 : vector<8x32xf32>
    %112 = math.exp %111 : vector<8x32xf32>
    %cst_24 = arith.constant 1.000000e+00 : f32
    %113 = vector.broadcast %cst_24 : f32 to vector<8x32xf32>
    %114 = arith.addf %113, %112 : vector<8x32xf32>
    %115 = arith.divf %113, %114 : vector<8x32xf32>
    %116 = arith.mulf %107, %90 : vector<8x32xf32>
    %117 = arith.mulf %101, %109 : vector<8x32xf32>
    %118 = arith.addf %116, %117 : vector<8x32xf32>
    %119 = math.tanh %118 : vector<8x32xf32>
    %120 = arith.mulf %115, %119 : vector<8x32xf32>
    %c0_25 = arith.constant 0 : index
    %c0_26 = arith.constant 0 : index
    %121 = vector.load %arg0[%c0_25, %c0_26] : memref<64x16xf32, #tpu.memory_space<vmem>>, vector<64x16xf32>
    %c0_27 = arith.constant 0 : index
    %c0_28 = arith.constant 0 : index
    %122 = vector.load %arg4[%c0_27, %c0_28] : memref<16x128xf32, #tpu.memory_space<vmem>>, vector<16x128xf32>
    %c0_29 = arith.constant 0 : index
    %c0_30 = arith.constant 0 : index
    %123 = vector.load %arg5[%c0_29, %c0_30] : memref<32x128xf32, #tpu.memory_space<vmem>>, vector<32x128xf32>
    %cst_31 = arith.constant dense<0.000000e+00> : vector<64x128xf32>
    %124 = tpu.matmul %121, %122, %cst_31 {dimension_numbers = #tpu.dot_dimension_numbers<[1], [0], [0], [1], [0, 0, 1, 1], [], []>} : vector<64x16xf32>, vector<16x128xf32>, vector<64x128xf32> -> vector<64x128xf32>
    %c0_32 = arith.constant 0 : index
    %c0_33 = arith.constant 0 : index
    %125 = vector.load %arg6[%c0_32, %c0_33] : memref<1x128xf32, #tpu.memory_space<vmem>>, vector<1x128xf32>
    %126 = vector.broadcast %125 : vector<1x128xf32> to vector<64x128xf32>
    %127 = arith.addf %124, %126 : vector<64x128xf32>
    %cst_34 = arith.constant 0.000000e+00 : f32
    %128 = vector.broadcast %cst_34 : f32 to vector<8x32xf32>
    %cst_35 = arith.constant 0.000000e+00 : f32
    %129 = vector.broadcast %cst_35 : f32 to vector<8x32xf32>
    %130 = vector.extract_strided_slice %127 {offsets = [0, 0], sizes = [8, 128], strides = [1, 1]} : vector<64x128xf32> to vector<8x128xf32>
    %cst_36 = arith.constant dense<0.000000e+00> : vector<8x128xf32>
    %131 = tpu.matmul %128, %123, %cst_36 {dimension_numbers = #tpu.dot_dimension_numbers<[1], [0], [0], [1], [0, 0, 1, 1], [], []>} : vector<8x32xf32>, vector<32x128xf32>, vector<8x128xf32> -> vector<8x128xf32>
    %132 = arith.addf %130, %131 : vector<8x128xf32>
    %133 = vector.extract_strided_slice %132 {offsets = [0, 0], sizes = [8, 32], strides = [1, 1]} : vector<8x128xf32> to vector<8x32xf32>
    %134 = arith.negf %133 : vector<8x32xf32>
    %135 = math.exp %134 : vector<8x32xf32>
    %cst_37 = arith.constant 1.000000e+00 : f32
    %136 = vector.broadcast %cst_37 : f32 to vector<8x32xf32>
    %137 = arith.addf %136, %135 : vector<8x32xf32>
    %138 = arith.divf %136, %137 : vector<8x32xf32>
    %139 = vector.extract_strided_slice %132 {offsets = [0, 32], sizes = [8, 32], strides = [1, 1]} : vector<8x128xf32> to vector<8x32xf32>
    %140 = arith.negf %139 : vector<8x32xf32>
    %141 = math.exp %140 : vector<8x32xf32>
    %cst_38 = arith.constant 1.000000e+00 : f32
    %142 = vector.broadcast %cst_38 : f32 to vector<8x32xf32>
    %143 = arith.addf %142, %141 : vector<8x32xf32>
    %144 = arith.divf %142, %143 : vector<8x32xf32>
    %145 = vector.extract_strided_slice %132 {offsets = [0, 64], sizes = [8, 32], strides = [1, 1]} : vector<8x128xf32> to vector<8x32xf32>
    %146 = math.tanh %145 : vector<8x32xf32>
    %147 = vector.extract_strided_slice %132 {offsets = [0, 96], sizes = [8, 32], strides = [1, 1]} : vector<8x128xf32> to vector<8x32xf32>
    %148 = arith.negf %147 : vector<8x32xf32>
    %149 = math.exp %148 : vector<8x32xf32>
    %cst_39 = arith.constant 1.000000e+00 : f32
    %150 = vector.broadcast %cst_39 : f32 to vector<8x32xf32>
    %151 = arith.addf %150, %149 : vector<8x32xf32>
    %152 = arith.divf %150, %151 : vector<8x32xf32>
    %153 = arith.mulf %144, %129 : vector<8x32xf32>
    %154 = arith.mulf %138, %146 : vector<8x32xf32>
    %155 = arith.addf %153, %154 : vector<8x32xf32>
    %156 = math.tanh %155 : vector<8x32xf32>
    %157 = arith.mulf %152, %156 : vector<8x32xf32>
    %158 = vector.extract_strided_slice %127 {offsets = [8, 0], sizes = [8, 128], strides = [1, 1]} : vector<64x128xf32> to vector<8x128xf32>
    %cst_40 = arith.constant dense<0.000000e+00> : vector<8x128xf32>
    %159 = tpu.matmul %157, %123, %cst_40 {dimension_numbers = #tpu.dot_dimension_numbers<[1], [0], [0], [1], [0, 0, 1, 1], [], []>} : vector<8x32xf32>, vector<32x128xf32>, vector<8x128xf32> -> vector<8x128xf32>
    %160 = arith.addf %158, %159 : vector<8x128xf32>
    %161 = vector.extract_strided_slice %160 {offsets = [0, 0], sizes = [8, 32], strides = [1, 1]} : vector<8x128xf32> to vector<8x32xf32>
    %162 = arith.negf %161 : vector<8x32xf32>
    %163 = math.exp %162 : vector<8x32xf32>
    %cst_41 = arith.constant 1.000000e+00 : f32
    %164 = vector.broadcast %cst_41 : f32 to vector<8x32xf32>
    %165 = arith.addf %164, %163 : vector<8x32xf32>
    %166 = arith.divf %164, %165 : vector<8x32xf32>
    %167 = vector.extract_strided_slice %160 {offsets = [0, 32], sizes = [8, 32], strides = [1, 1]} : vector<8x128xf32> to vector<8x32xf32>
    %168 = arith.negf %167 : vector<8x32xf32>
    %169 = math.exp %168 : vector<8x32xf32>
    %cst_42 = arith.constant 1.000000e+00 : f32
    %170 = vector.broadcast %cst_42 : f32 to vector<8x32xf32>
    %171 = arith.addf %170, %169 : vector<8x32xf32>
    %172 = arith.divf %170, %171 : vector<8x32xf32>
    %173 = vector.extract_strided_slice %160 {offsets = [0, 64], sizes = [8, 32], strides = [1, 1]} : vector<8x128xf32> to vector<8x32xf32>
    %174 = math.tanh %173 : vector<8x32xf32>
    %175 = vector.extract_strided_slice %160 {offsets = [0, 96], sizes = [8, 32], strides = [1, 1]} : vector<8x128xf32> to vector<8x32xf32>
    %176 = arith.negf %175 : vector<8x32xf32>
    %177 = math.exp %176 : vector<8x32xf32>
    %cst_43 = arith.constant 1.000000e+00 : f32
    %178 = vector.broadcast %cst_43 : f32 to vector<8x32xf32>
    %179 = arith.addf %178, %177 : vector<8x32xf32>
    %180 = arith.divf %178, %179 : vector<8x32xf32>
    %181 = arith.mulf %172, %155 : vector<8x32xf32>
    %182 = arith.mulf %166, %174 : vector<8x32xf32>
    %183 = arith.addf %181, %182 : vector<8x32xf32>
    %184 = math.tanh %183 : vector<8x32xf32>
    %185 = arith.mulf %180, %184 : vector<8x32xf32>
    %186 = vector.extract_strided_slice %127 {offsets = [16, 0], sizes = [8, 128], strides = [1, 1]} : vector<64x128xf32> to vector<8x128xf32>
    %cst_44 = arith.constant dense<0.000000e+00> : vector<8x128xf32>
    %187 = tpu.matmul %185, %123, %cst_44 {dimension_numbers = #tpu.dot_dimension_numbers<[1], [0], [0], [1], [0, 0, 1, 1], [], []>} : vector<8x32xf32>, vector<32x128xf32>, vector<8x128xf32> -> vector<8x128xf32>
    %188 = arith.addf %186, %187 : vector<8x128xf32>
    %189 = vector.extract_strided_slice %188 {offsets = [0, 0], sizes = [8, 32], strides = [1, 1]} : vector<8x128xf32> to vector<8x32xf32>
    %190 = arith.negf %189 : vector<8x32xf32>
    %191 = math.exp %190 : vector<8x32xf32>
    %cst_45 = arith.constant 1.000000e+00 : f32
    %192 = vector.broadcast %cst_45 : f32 to vector<8x32xf32>
    %193 = arith.addf %192, %191 : vector<8x32xf32>
    %194 = arith.divf %192, %193 : vector<8x32xf32>
    %195 = vector.extract_strided_slice %188 {offsets = [0, 32], sizes = [8, 32], strides = [1, 1]} : vector<8x128xf32> to vector<8x32xf32>
    %196 = arith.negf %195 : vector<8x32xf32>
    %197 = math.exp %196 : vector<8x32xf32>
    %cst_46 = arith.constant 1.000000e+00 : f32
    %198 = vector.broadcast %cst_46 : f32 to vector<8x32xf32>
    %199 = arith.addf %198, %197 : vector<8x32xf32>
    %200 = arith.divf %198, %199 : vector<8x32xf32>
    %201 = vector.extract_strided_slice %188 {offsets = [0, 64], sizes = [8, 32], strides = [1, 1]} : vector<8x128xf32> to vector<8x32xf32>
    %202 = math.tanh %201 : vector<8x32xf32>
    %203 = vector.extract_strided_slice %188 {offsets = [0, 96], sizes = [8, 32], strides = [1, 1]} : vector<8x128xf32> to vector<8x32xf32>
    %204 = arith.negf %203 : vector<8x32xf32>
    %205 = math.exp %204 : vector<8x32xf32>
    %cst_47 = arith.constant 1.000000e+00 : f32
    %206 = vector.broadcast %cst_47 : f32 to vector<8x32xf32>
    %207 = arith.addf %206, %205 : vector<8x32xf32>
    %208 = arith.divf %206, %207 : vector<8x32xf32>
    %209 = arith.mulf %200, %183 : vector<8x32xf32>
    %210 = arith.mulf %194, %202 : vector<8x32xf32>
    %211 = arith.addf %209, %210 : vector<8x32xf32>
    %212 = math.tanh %211 : vector<8x32xf32>
    %213 = arith.mulf %208, %212 : vector<8x32xf32>
    %214 = vector.extract_strided_slice %127 {offsets = [24, 0], sizes = [8, 128], strides = [1, 1]} : vector<64x128xf32> to vector<8x128xf32>
    %cst_48 = arith.constant dense<0.000000e+00> : vector<8x128xf32>
    %215 = tpu.matmul %213, %123, %cst_48 {dimension_numbers = #tpu.dot_dimension_numbers<[1], [0], [0], [1], [0, 0, 1, 1], [], []>} : vector<8x32xf32>, vector<32x128xf32>, vector<8x128xf32> -> vector<8x128xf32>
    %216 = arith.addf %214, %215 : vector<8x128xf32>
    %217 = vector.extract_strided_slice %216 {offsets = [0, 0], sizes = [8, 32], strides = [1, 1]} : vector<8x128xf32> to vector<8x32xf32>
    %218 = arith.negf %217 : vector<8x32xf32>
    %219 = math.exp %218 : vector<8x32xf32>
    %cst_49 = arith.constant 1.000000e+00 : f32
    %220 = vector.broadcast %cst_49 : f32 to vector<8x32xf32>
    %221 = arith.addf %220, %219 : vector<8x32xf32>
    %222 = arith.divf %220, %221 : vector<8x32xf32>
    %223 = vector.extract_strided_slice %216 {offsets = [0, 32], sizes = [8, 32], strides = [1, 1]} : vector<8x128xf32> to vector<8x32xf32>
    %224 = arith.negf %223 : vector<8x32xf32>
    %225 = math.exp %224 : vector<8x32xf32>
    %cst_50 = arith.constant 1.000000e+00 : f32
    %226 = vector.broadcast %cst_50 : f32 to vector<8x32xf32>
    %227 = arith.addf %226, %225 : vector<8x32xf32>
    %228 = arith.divf %226, %227 : vector<8x32xf32>
    %229 = vector.extract_strided_slice %216 {offsets = [0, 64], sizes = [8, 32], strides = [1, 1]} : vector<8x128xf32> to vector<8x32xf32>
    %230 = math.tanh %229 : vector<8x32xf32>
    %231 = vector.extract_strided_slice %216 {offsets = [0, 96], sizes = [8, 32], strides = [1, 1]} : vector<8x128xf32> to vector<8x32xf32>
    %232 = arith.negf %231 : vector<8x32xf32>
    %233 = math.exp %232 : vector<8x32xf32>
    %cst_51 = arith.constant 1.000000e+00 : f32
    %234 = vector.broadcast %cst_51 : f32 to vector<8x32xf32>
    %235 = arith.addf %234, %233 : vector<8x32xf32>
    %236 = arith.divf %234, %235 : vector<8x32xf32>
    %237 = arith.mulf %228, %211 : vector<8x32xf32>
    %238 = arith.mulf %222, %230 : vector<8x32xf32>
    %239 = arith.addf %237, %238 : vector<8x32xf32>
    %240 = math.tanh %239 : vector<8x32xf32>
    %241 = arith.mulf %236, %240 : vector<8x32xf32>
    %242 = vector.extract_strided_slice %127 {offsets = [32, 0], sizes = [8, 128], strides = [1, 1]} : vector<64x128xf32> to vector<8x128xf32>
    %cst_52 = arith.constant dense<0.000000e+00> : vector<8x128xf32>
    %243 = tpu.matmul %241, %123, %cst_52 {dimension_numbers = #tpu.dot_dimension_numbers<[1], [0], [0], [1], [0, 0, 1, 1], [], []>} : vector<8x32xf32>, vector<32x128xf32>, vector<8x128xf32> -> vector<8x128xf32>
    %244 = arith.addf %242, %243 : vector<8x128xf32>
    %245 = vector.extract_strided_slice %244 {offsets = [0, 0], sizes = [8, 32], strides = [1, 1]} : vector<8x128xf32> to vector<8x32xf32>
    %246 = arith.negf %245 : vector<8x32xf32>
    %247 = math.exp %246 : vector<8x32xf32>
    %cst_53 = arith.constant 1.000000e+00 : f32
    %248 = vector.broadcast %cst_53 : f32 to vector<8x32xf32>
    %249 = arith.addf %248, %247 : vector<8x32xf32>
    %250 = arith.divf %248, %249 : vector<8x32xf32>
    %251 = vector.extract_strided_slice %244 {offsets = [0, 32], sizes = [8, 32], strides = [1, 1]} : vector<8x128xf32> to vector<8x32xf32>
    %252 = arith.negf %251 : vector<8x32xf32>
    %253 = math.exp %252 : vector<8x32xf32>
    %cst_54 = arith.constant 1.000000e+00 : f32
    %254 = vector.broadcast %cst_54 : f32 to vector<8x32xf32>
    %255 = arith.addf %254, %253 : vector<8x32xf32>
    %256 = arith.divf %254, %255 : vector<8x32xf32>
    %257 = vector.extract_strided_slice %244 {offsets = [0, 64], sizes = [8, 32], strides = [1, 1]} : vector<8x128xf32> to vector<8x32xf32>
    %258 = math.tanh %257 : vector<8x32xf32>
    %259 = vector.extract_strided_slice %244 {offsets = [0, 96], sizes = [8, 32], strides = [1, 1]} : vector<8x128xf32> to vector<8x32xf32>
    %260 = arith.negf %259 : vector<8x32xf32>
    %261 = math.exp %260 : vector<8x32xf32>
    %cst_55 = arith.constant 1.000000e+00 : f32
    %262 = vector.broadcast %cst_55 : f32 to vector<8x32xf32>
    %263 = arith.addf %262, %261 : vector<8x32xf32>
    %264 = arith.divf %262, %263 : vector<8x32xf32>
    %265 = arith.mulf %256, %239 : vector<8x32xf32>
    %266 = arith.mulf %250, %258 : vector<8x32xf32>
    %267 = arith.addf %265, %266 : vector<8x32xf32>
    %268 = math.tanh %267 : vector<8x32xf32>
    %269 = arith.mulf %264, %268 : vector<8x32xf32>
    %270 = vector.extract_strided_slice %127 {offsets = [40, 0], sizes = [8, 128], strides = [1, 1]} : vector<64x128xf32> to vector<8x128xf32>
    %cst_56 = arith.constant dense<0.000000e+00> : vector<8x128xf32>
    %271 = tpu.matmul %269, %123, %cst_56 {dimension_numbers = #tpu.dot_dimension_numbers<[1], [0], [0], [1], [0, 0, 1, 1], [], []>} : vector<8x32xf32>, vector<32x128xf32>, vector<8x128xf32> -> vector<8x128xf32>
    %272 = arith.addf %270, %271 : vector<8x128xf32>
    %273 = vector.extract_strided_slice %272 {offsets = [0, 0], sizes = [8, 32], strides = [1, 1]} : vector<8x128xf32> to vector<8x32xf32>
    %274 = arith.negf %273 : vector<8x32xf32>
    %275 = math.exp %274 : vector<8x32xf32>
    %cst_57 = arith.constant 1.000000e+00 : f32
    %276 = vector.broadcast %cst_57 : f32 to vector<8x32xf32>
    %277 = arith.addf %276, %275 : vector<8x32xf32>
    %278 = arith.divf %276, %277 : vector<8x32xf32>
    %279 = vector.extract_strided_slice %272 {offsets = [0, 32], sizes = [8, 32], strides = [1, 1]} : vector<8x128xf32> to vector<8x32xf32>
    %280 = arith.negf %279 : vector<8x32xf32>
    %281 = math.exp %280 : vector<8x32xf32>
    %cst_58 = arith.constant 1.000000e+00 : f32
    %282 = vector.broadcast %cst_58 : f32 to vector<8x32xf32>
    %283 = arith.addf %282, %281 : vector<8x32xf32>
    %284 = arith.divf %282, %283 : vector<8x32xf32>
    %285 = vector.extract_strided_slice %272 {offsets = [0, 64], sizes = [8, 32], strides = [1, 1]} : vector<8x128xf32> to vector<8x32xf32>
    %286 = math.tanh %285 : vector<8x32xf32>
    %287 = vector.extract_strided_slice %272 {offsets = [0, 96], sizes = [8, 32], strides = [1, 1]} : vector<8x128xf32> to vector<8x32xf32>
    %288 = arith.negf %287 : vector<8x32xf32>
    %289 = math.exp %288 : vector<8x32xf32>
    %cst_59 = arith.constant 1.000000e+00 : f32
    %290 = vector.broadcast %cst_59 : f32 to vector<8x32xf32>
    %291 = arith.addf %290, %289 : vector<8x32xf32>
    %292 = arith.divf %290, %291 : vector<8x32xf32>
    %293 = arith.mulf %284, %267 : vector<8x32xf32>
    %294 = arith.mulf %278, %286 : vector<8x32xf32>
    %295 = arith.addf %293, %294 : vector<8x32xf32>
    %296 = math.tanh %295 : vector<8x32xf32>
    %297 = arith.mulf %292, %296 : vector<8x32xf32>
    %298 = vector.extract_strided_slice %127 {offsets = [48, 0], sizes = [8, 128], strides = [1, 1]} : vector<64x128xf32> to vector<8x128xf32>
    %cst_60 = arith.constant dense<0.000000e+00> : vector<8x128xf32>
    %299 = tpu.matmul %297, %123, %cst_60 {dimension_numbers = #tpu.dot_dimension_numbers<[1], [0], [0], [1], [0, 0, 1, 1], [], []>} : vector<8x32xf32>, vector<32x128xf32>, vector<8x128xf32> -> vector<8x128xf32>
    %300 = arith.addf %298, %299 : vector<8x128xf32>
    %301 = vector.extract_strided_slice %300 {offsets = [0, 0], sizes = [8, 32], strides = [1, 1]} : vector<8x128xf32> to vector<8x32xf32>
    %302 = arith.negf %301 : vector<8x32xf32>
    %303 = math.exp %302 : vector<8x32xf32>
    %cst_61 = arith.constant 1.000000e+00 : f32
    %304 = vector.broadcast %cst_61 : f32 to vector<8x32xf32>
    %305 = arith.addf %304, %303 : vector<8x32xf32>
    %306 = arith.divf %304, %305 : vector<8x32xf32>
    %307 = vector.extract_strided_slice %300 {offsets = [0, 32], sizes = [8, 32], strides = [1, 1]} : vector<8x128xf32> to vector<8x32xf32>
    %308 = arith.negf %307 : vector<8x32xf32>
    %309 = math.exp %308 : vector<8x32xf32>
    %cst_62 = arith.constant 1.000000e+00 : f32
    %310 = vector.broadcast %cst_62 : f32 to vector<8x32xf32>
    %311 = arith.addf %310, %309 : vector<8x32xf32>
    %312 = arith.divf %310, %311 : vector<8x32xf32>
    %313 = vector.extract_strided_slice %300 {offsets = [0, 64], sizes = [8, 32], strides = [1, 1]} : vector<8x128xf32> to vector<8x32xf32>
    %314 = math.tanh %313 : vector<8x32xf32>
    %315 = vector.extract_strided_slice %300 {offsets = [0, 96], sizes = [8, 32], strides = [1, 1]} : vector<8x128xf32> to vector<8x32xf32>
    %316 = arith.negf %315 : vector<8x32xf32>
    %317 = math.exp %316 : vector<8x32xf32>
    %cst_63 = arith.constant 1.000000e+00 : f32
    %318 = vector.broadcast %cst_63 : f32 to vector<8x32xf32>
    %319 = arith.addf %318, %317 : vector<8x32xf32>
    %320 = arith.divf %318, %319 : vector<8x32xf32>
    %321 = arith.mulf %312, %295 : vector<8x32xf32>
    %322 = arith.mulf %306, %314 : vector<8x32xf32>
    %323 = arith.addf %321, %322 : vector<8x32xf32>
    %324 = math.tanh %323 : vector<8x32xf32>
    %325 = arith.mulf %320, %324 : vector<8x32xf32>
    %326 = vector.extract_strided_slice %127 {offsets = [56, 0], sizes = [8, 128], strides = [1, 1]} : vector<64x128xf32> to vector<8x128xf32>
    %cst_64 = arith.constant dense<0.000000e+00> : vector<8x128xf32>
    %327 = tpu.matmul %325, %123, %cst_64 {dimension_numbers = #tpu.dot_dimension_numbers<[1], [0], [0], [1], [0, 0, 1, 1], [], []>} : vector<8x32xf32>, vector<32x128xf32>, vector<8x128xf32> -> vector<8x128xf32>
    %328 = arith.addf %326, %327 : vector<8x128xf32>
    %329 = vector.extract_strided_slice %328 {offsets = [0, 0], sizes = [8, 32], strides = [1, 1]} : vector<8x128xf32> to vector<8x32xf32>
    %330 = arith.negf %329 : vector<8x32xf32>
    %331 = math.exp %330 : vector<8x32xf32>
    %cst_65 = arith.constant 1.000000e+00 : f32
    %332 = vector.broadcast %cst_65 : f32 to vector<8x32xf32>
    %333 = arith.addf %332, %331 : vector<8x32xf32>
    %334 = arith.divf %332, %333 : vector<8x32xf32>
    %335 = vector.extract_strided_slice %328 {offsets = [0, 32], sizes = [8, 32], strides = [1, 1]} : vector<8x128xf32> to vector<8x32xf32>
    %336 = arith.negf %335 : vector<8x32xf32>
    %337 = math.exp %336 : vector<8x32xf32>
    %cst_66 = arith.constant 1.000000e+00 : f32
    %338 = vector.broadcast %cst_66 : f32 to vector<8x32xf32>
    %339 = arith.addf %338, %337 : vector<8x32xf32>
    %340 = arith.divf %338, %339 : vector<8x32xf32>
    %341 = vector.extract_strided_slice %328 {offsets = [0, 64], sizes = [8, 32], strides = [1, 1]} : vector<8x128xf32> to vector<8x32xf32>
    %342 = math.tanh %341 : vector<8x32xf32>
    %343 = vector.extract_strided_slice %328 {offsets = [0, 96], sizes = [8, 32], strides = [1, 1]} : vector<8x128xf32> to vector<8x32xf32>
    %344 = arith.negf %343 : vector<8x32xf32>
    %345 = math.exp %344 : vector<8x32xf32>
    %cst_67 = arith.constant 1.000000e+00 : f32
    %346 = vector.broadcast %cst_67 : f32 to vector<8x32xf32>
    %347 = arith.addf %346, %345 : vector<8x32xf32>
    %348 = arith.divf %346, %347 : vector<8x32xf32>
    %349 = arith.mulf %340, %323 : vector<8x32xf32>
    %350 = arith.mulf %334, %342 : vector<8x32xf32>
    %351 = arith.addf %349, %350 : vector<8x32xf32>
    %352 = math.tanh %351 : vector<8x32xf32>
    %353 = arith.mulf %348, %352 : vector<8x32xf32>
    %c0_68 = arith.constant 0 : index
    %c0_69 = arith.constant 0 : index
    %354 = vector.load %arg7[%c0_68, %c0_69] : memref<1x32xf32, #tpu.memory_space<vmem>>, vector<1x32xf32>
    %355 = vector.broadcast %354 : vector<1x32xf32> to vector<8x32xf32>
    %356 = arith.mulf %120, %355 : vector<8x32xf32>
    %cst_70 = arith.constant dense<0.000000e+00> : vector<8xf32>
    %357 = vector.multi_reduction <add>, %356, %cst_70 [1] : vector<8x32xf32> to vector<8xf32>
    %358 = vector.shape_cast %357 : vector<8xf32> to vector<8x1xf32>
    %c0_71 = arith.constant 0 : index
    %c0_72 = arith.constant 0 : index
    %359 = vector.load %arg8[%c0_71, %c0_72] : memref<1x32xf32, #tpu.memory_space<vmem>>, vector<1x32xf32>
    %360 = vector.broadcast %359 : vector<1x32xf32> to vector<8x32xf32>
    %361 = arith.mulf %353, %360 : vector<8x32xf32>
    %cst_73 = arith.constant dense<0.000000e+00> : vector<8xf32>
    %362 = vector.multi_reduction <add>, %361, %cst_73 [1] : vector<8x32xf32> to vector<8xf32>
    %363 = vector.shape_cast %362 : vector<8xf32> to vector<8x1xf32>
    %364 = arith.addf %358, %363 : vector<8x1xf32>
    %c0_74 = arith.constant 0 : index
    %c0_75 = arith.constant 0 : index
    %365 = vector.load %arg9[%c0_74, %c0_75] : memref<1x1xf32, #tpu.memory_space<vmem>>, vector<1x1xf32>
    %366 = vector.broadcast %365 : vector<1x1xf32> to vector<8x1xf32>
    %367 = arith.addf %364, %366 : vector<8x1xf32>
    %c0_76 = arith.constant 0 : index
    %c0_77 = arith.constant 0 : index
    %368 = vector.load %arg10[%c0_76, %c0_77] : memref<8x1xf32, #tpu.memory_space<vmem>>, vector<8x1xf32>
    tpu.vector_store %arg10[%c0_76, %c0_77], %367 {strides = array<i32>} : memref<8x1xf32, #tpu.memory_space<vmem>>, vector<8x1xf32>,
    return
  }
}

</mosaic_0001>

<bundles_post_ra>
// kernel: critic_forward.1
= control target key start
LH: loop header
LB: loop body
LE: loop exit
PB: predicated region body
PF: predicated region fallthrough
CT: control target
= control target key end

     0   :  { %vm51_vm0 = vcmask 130048   ;;  %v1107_v7 = vmov 0.0   ;;  %vm93_vm5 = vcmask 261120   ;;  %s1110_s13 = smov 96   ;;  %s1404_s2 = inlined_call_operand.vmem [shape: f32[32,128], index: 2, kind: input, shape index: {}]   ;;  %s1405_s1 = inlined_call_operand.vmem [shape: f32[16,128], index: 1, kind: input, shape index: {}]   ;;  %s1406_s0 = inlined_call_operand.vmem [shape: f32[64,16], index: 0, kind: input, shape index: {}]   ;;  %s1407_s3 = inlined_call_operand.vmem [shape: f32[1,128], index: 3, kind: input, shape index: {}]   ;;  %s1408_s5 = inlined_call_operand.vmem [shape: f32[32,128], index: 5, kind: input, shape index: {}]   ;;  %s1409_s4 = inlined_call_operand.vmem [shape: f32[16,128], index: 4, kind: input, shape index: {}]   ;;  %s1410_s6 = inlined_call_operand.vmem [shape: f32[1,128], index: 6, kind: input, shape index: {}]   ;;  %s1411_s7 = inlined_call_operand.vmem [shape: f32[1,32], index: 7, kind: input, shape index: {}]   ;;  %s1412_s8 = inlined_call_operand.vmem [shape: f32[1,32], index: 8, kind: input, shape index: {}]   ;;  %s1413_s9 = inlined_call_operand.<no memory space> [shape: f32[1,1], index: 9, kind: input, shape index: {}]   ;;  %s1414_s10 = inlined_call_operand.vmem [shape: f32[8,1], index: 10, kind: output, shape index: {}]  }
   0x1   :  { %v46_v0 = vld [vmem:[%s1404_s2 + $0x18] sm:$0xff]  ;;  %v42_v1 = vld [vmem:[%s1405_s1 + $0x8] sm:$0xff]  ;;  %v45_v2 = vld [vmem:[%s1404_s2 + $0x10] sm:$0xff] }
   0x2   :  { %109 = vmatpush.msra.mxu1 %v46_v0  ;;  %78 = vmatpush.msra.mxu0 %v42_v1  ;;  %v41_v3 = vld [vmem:[%s1405_s1] sm:$0xff]  ;;  %v44_v5 = vld [vmem:[%s1404_s2 + $0x8] sm:$0xff]  ;;  %v1211_v34 = vld [vmem:[%s1406_s0 + $0x10] sm:$0xff] }
   0x3   :  { %v1181_v4 = vld [vmem:[%s1406_s0] sm:$0xff]  ;;  %235 = vmatpush.msra.mxu3 %v46_v0  ;;  %v1204_v33 = vld [vmem:[%s1406_s0 + $0x8] sm:$0xff]  ;;  %v1218_v35 = vld [vmem:[%s1406_s0 + $0x18] sm:$0xff] }
   0x4   :  { %110 = vmatpush.msra.mxu1 %v45_v2  ;;  %79 = vmatpush.msra.mxu0 %v41_v3  ;;  %v43_v6 = vld [vmem:[%s1404_s2] sm:$0xff]  ;;  %s1108_s2 = smov 64  }
   0x5   :  { %966 = vmatmul.msk.f32.vlgmr.msra.gmra.mxu0 %vm51_vm0, %v1181_v4  ;;  %236 = vmatpush.msra.mxu3 %v45_v2  ;;  %v1195_v8 = vld [vmem:[%s1407_s3] ss:$0 sm:$0xff]  ;;  %s1109_s3 = smov 32  }
   0x6   :  { %111 = vmatpush.msra.mxu1 %v44_v5  ;;  %172 = vmatpush.msrb.mxu0 %v46_v0 }
   0x7   :  { %237 = vmatpush.msra.mxu3 %v44_v5 }
   0x8   :  { %112 = vmatpush.msra.mxu1 %v43_v6  ;;  %173 = vmatpush.msrb.mxu0 %v45_v2 }
   0x9   :  { %113 = vmatmul.f32.vlgmr.msra.gmra.mxu1 %v1107_v7  ;;  %238 = vmatpush.msra.mxu3 %v43_v6 }
   0xa   :  { %174 = vmatpush.msrb.mxu0 %v44_v5  ;;  %298 = vmatpush.msrb.mxu1 %v46_v0 }
   0xc   :  { %175 = vmatpush.msrb.mxu0 %v43_v6  ;;  %299 = vmatpush.msrb.mxu1 %v45_v2 }
   0xd   :  { %967 = vmatmul.msk.f32.gmra.mxu0 %vm51_vm0, %v1204_v33 }
   0xe   :  { %300 = vmatpush.msrb.mxu1 %v44_v5 }
  0x10   :  { %301 = vmatpush.msrb.mxu1 %v43_v6 }
  0x15   :  { %968 = vmatmul.msk.f32.gmra.mxu0 %vm51_vm0, %v1211_v34 }
  0x1d   :  { %969 = vmatmul.msk.f32.gmra.mxu0 %vm51_vm0, %v1218_v35 }
  0x82   :  { %v81_v9 = vpop.f32.mrf.mxu0 }
  0x83   :  { %v82_v10 = vadd.f32 %v1195_v8, %v81_v9 }
  0x86   :  { %v114_v11 = vpop.f32.mrf.mxu1 }
  0x87   :  { %v117_v12 = vadd.f32 %v114_v11, %v82_v10 }
  0x89   :  { %1011 = vtanh.f32 %v117_v12  ;;  %v970_v14 = vmul.f32 -1.442695, %v117_v12 }
  0x8a   :  { %v84_v39 = vpop.f32.mrf.mxu0 }
  0x8b   :  { %1013 = vpow2.f32 %v970_v14  ;;  %v85_v42 = vadd.f32 %v1195_v8, %v84_v39  ;;  %v1265_v39 = vld [vmem:[%s1408_s5] sm:$0xff] }
  0x8f   :  { %v1012_v13 = vpop.eup %1011 }
  0x90   :  { %140 = vrot.lane.b32.xlu0 %v1012_v13, %s1108_s2 }
  0x91   :  { %v1014_v15 = vpop.eup %1013 }
  0x92   :  { %v121_v16 = vadd.f32 1.0, %v1014_v15  ;;  %v87_v40 = vpop.f32.mrf.mxu0 }
  0x93   :  { %v88_v5 = vadd.f32 %v1195_v8, %v87_v40  ;;  %v352_v40 = vld [vmem:[%s1409_s4] sm:$0xff] }
  0x94   :  { %1015 = vrcp.f32 %v121_v16  ;;  %v133_v22 = vand.u32 2147483648, %v121_v16  ;;  %vm127_vm2 = vweird.f32 %v121_v16  ;;  %v131_v23 = vand.u32 2147483647, %v121_v16 }
  0x96   :  { %v134_v25 = vor.u32 1.1754944e-38, %v133_v22  ;;  %vm132_vm4 = vcmp.eq.f32.partialorder %v131_v23, 8.507059e+37 }
  0x9a   :  { %v1016_v17 = vpop.eup %1015  ;;  %v1224_v41 = vpop.f32.mrf.mxu0 }
  0x9b   :  { %v123_v18 = vmul.f32 %v1016_v17, %v121_v16  ;;  %vm128_vm1 = vweird.f32 %v1016_v17 }
  0x9c   :  { %vm129_vm3 = vmor %vm127_vm2, %vm128_vm1 }
  0x9d   :  { %v124_v19 = vsub.f32 1.0, %v123_v18 }
  0x9f   :  { %v125_v20 = vmul.f32 %v1016_v17, %v124_v19 }
  0xa1   :  { %v126_v21 = vadd.f32 %v1016_v17, %v125_v20 }
  0xa3   :  { %v130_v24 = vsel %vm129_vm3, %v1016_v17, %v126_v21 }
  0xa4   :  { %v135_v27 = vsel %vm132_vm4, %v134_v25, %v130_v24 }
  0xa5   :  { %v138_v29 = vmul.f32 0.0, %v135_v27 }
 0x102   :  { %v141_v26 = vpop.permute.xlu0 %140 }
 0x103   :  { %v143_v28 = vmul.f32 %v141_v26, %v135_v27 }
 0x105   :  { %145 = vrot.lane.b32.xlu0 %v143_v28, %s1109_s3 }
 0x177   :  { %v146_v30 = vpop.permute.xlu0 %145 }
 0x178   :  { %v148_v31 = vadd.f32 %v146_v30, %v138_v29  ;;  %v1242_v30 = vld [vmem:[%s1408_s5 + $0x18] sm:$0xff] }
 0x179   :  { %439 = vmatpush.msrb.mxu3 %v1242_v30  ;;  %754 = vmatpush.msra.mxu0 %v1242_v30 }
 0x17a   :  { %1017 = vtanh.f32 %v148_v31 }
 0x180   :  { %v1018_v32 = vpop.eup %1017 }
 0x181   :  { %151 = vrot.lane.b32.xlu1 %v1018_v32, %s1108_s2 }
 0x1f3   :  { %v152_v36 = vpop.permute.xlu1 %151 }
 0x1f4   :  { %v154_v37 = vmul.f32 %v152_v36, %v135_v27 }
 0x1f6   :  { %156 = vrot.lane.b32.xlu1 %v154_v37, %s1109_s3  ;;  %v353_v37 = vld [vmem:[%s1409_s4 + $0x8] sm:$0xff] }
 0x1f7   :  { %400 = vmatpush.msra.mxu1 %v353_v37  ;;  %1000 = vmatpush.msra.mxu2 %v353_v37 }
 0x1f9   :  { %401 = vmatpush.msra.mxu1 %v352_v40  ;;  %1001 = vmatpush.msra.mxu2 %v352_v40 }
 0x1fa   :  { %978 = vmatmul.msk.f32.vlgmr.msra.gmra.mxu2 %vm51_vm0, %v1204_v33 }
 0x202   :  { %979 = vmatmul.msk.f32.gmra.mxu2 %vm51_vm0, %v1211_v34  ;;  %v1305_v34 = vld [vmem:[%s1410_s6] ss:$0 sm:$0xff] }
 0x20a   :  { %980 = vmatmul.msk.f32.gmra.mxu2 %vm51_vm0, %v1218_v35 }
 0x268   :  { %v157_v38 = vpop.permute.xlu1 %156 }
 0x269   :  { %971 = vmatmul.msk.f32.vlgmr.msrb.gmra.mxu0 %vm93_vm5, %v157_v38  ;;  %v1260_v38 = vld [vmem:[%s1408_s5 + $0x8] sm:$0xff] }
 0x2e6   :  { %v177_v43 = vpop.f32.mrf.mxu0 }
 0x2e7   :  { %v180_v44 = vadd.f32 %v177_v43, %v85_v42 }
 0x2e9   :  { %1019 = vtanh.f32 %v180_v44  ;;  %v972_v46 = vmul.f32 -1.442695, %v180_v44 }
 0x2eb   :  { %1021 = vpow2.f32 %v972_v46 }
 0x2ef   :  { %v1020_v45 = vpop.eup %1019 }
 0x2f0   :  { %203 = vrot.lane.b32.xlu2 %v1020_v45, %s1108_s2 }
 0x2f1   :  { %v1022_v47 = vpop.eup %1021 }
 0x2f2   :  { %v184_v48 = vadd.f32 1.0, %v1022_v47 }
 0x2f4   :  { %1023 = vrcp.f32 %v184_v48  ;;  %v196_v54 = vand.u32 2147483648, %v184_v48  ;;  %vm190_vm7 = vweird.f32 %v184_v48  ;;  %v194_v55 = vand.u32 2147483647, %v184_v48 }
 0x2f6   :  { %v197_v57 = vor.u32 1.1754944e-38, %v196_v54  ;;  %vm195_vm9 = vcmp.eq.f32.partialorder %v194_v55, 8.507059e+37 }
 0x2fa   :  { %v1024_v49 = vpop.eup %1023 }
 0x2fb   :  { %v186_v50 = vmul.f32 %v1024_v49, %v184_v48  ;;  %vm191_vm6 = vweird.f32 %v1024_v49 }
 0x2fc   :  { %vm192_vm8 = vmor %vm190_vm7, %vm191_vm6 }
 0x2fd   :  { %v187_v51 = vsub.f32 1.0, %v186_v50 }
 0x2ff   :  { %v188_v52 = vmul.f32 %v1024_v49, %v187_v51 }
 0x301   :  { %v189_v53 = vadd.f32 %v1024_v49, %v188_v52 }
 0x303   :  { %v193_v56 = vsel %vm192_vm8, %v1024_v49, %v189_v53 }
 0x304   :  { %v198_v59 = vsel %vm195_vm9, %v197_v57, %v193_v56 }
 0x305   :  { %v201_v61 = vmul.f32 %v198_v59, %v148_v31  ;;  %v1247_v31 = vld [vmem:[%s1408_s5 + $0x10] sm:$0xff] }
 0x306   :  { %440 = vmatpush.msrb.mxu3 %v1247_v31  ;;  %755 = vmatpush.msra.mxu0 %v1247_v31 }
 0x308   :  { %441 = vmatpush.msrb.mxu3 %v1260_v38  ;;  %756 = vmatpush.msra.mxu0 %v1260_v38 }
 0x30a   :  { %442 = vmatpush.msrb.mxu3 %v1265_v39  ;;  %757 = vmatpush.msra.mxu0 %v1265_v39 }
 0x34a   :  { %v204_v58 = vpop.permute.xlu2 %203 }
 0x34b   :  { %v206_v60 = vmul.f32 %v204_v58, %v198_v59 }
 0x34d   :  { %208 = vrot.lane.b32.xlu2 %v206_v60, %s1109_s3 }
 0x3a7   :  { %v209_v62 = vpop.permute.xlu2 %208 }
 0x3a8   :  { %v211_v63 = vadd.f32 %v209_v62, %v201_v61 }
 0x3aa   :  { %1025 = vtanh.f32 %v211_v63 }
 0x3b0   :  { %v1026_v0 = vpop.eup %1025 }
 0x3b1   :  { %214 = vrot.lane.b32.xlu0 %v1026_v0, %s1108_s2 }
 0x423   :  { %v215_v1 = vpop.permute.xlu0 %214 }
 0x424   :  { %v217_v2 = vmul.f32 %v215_v1, %v198_v59 }
 0x426   :  { %219 = vrot.lane.b32.xlu1 %v217_v2, %s1109_s3 }
 0x498   :  { %v220_v3 = vpop.permute.xlu1 %219 }
 0x499   :  { %973 = vmatmul.msk.f32.vlgmr.msra.gmra.mxu3 %vm93_vm5, %v220_v3  ;;  %v406_v3 = vpop.f32.mrf.mxu2 }
 0x49a   :  { %565 = vmatpush.msra.mxu3 %v1242_v30 }
 0x49c   :  { %566 = vmatpush.msra.mxu3 %v1247_v31 }
 0x49e   :  { %567 = vmatpush.msra.mxu3 %v1260_v38 }
 0x4a0   :  { %568 = vmatpush.msra.mxu3 %v1265_v39 }
 0x4a1   :  { %443 = vmatmul.f32.vlgmr.msrb.gmra.mxu3 %v1107_v7 }
 0x4a2   :  { %691 = vmatpush.msrb.mxu3 %v1242_v30 }
 0x4a4   :  { %692 = vmatpush.msrb.mxu3 %v1247_v31 }
 0x4a6   :  { %693 = vmatpush.msrb.mxu3 %v1260_v38 }
 0x4a8   :  { %694 = vmatpush.msrb.mxu3 %v1265_v39 }
 0x51c   :  { %v240_v6 = vpop.f32.mrf.mxu3 }
 0x51d   :  { %v243_v9 = vadd.f32 %v240_v6, %v88_v5  ;;  %v407_v5 = vadd.f32 %v1305_v34, %v406_v3 }
 0x51f   :  { %1027 = vtanh.f32 %v243_v9  ;;  %v974_v11 = vmul.f32 -1.442695, %v243_v9 }
 0x521   :  { %1029 = vpow2.f32 %v974_v11 }
 0x524   :  { %v444_v42 = vpop.f32.mrf.mxu3 }
 0x525   :  { %v1028_v10 = vpop.eup %1027 }
 0x526   :  { %266 = vrot.lane.b32.xlu2 %v1028_v10, %s1108_s2 }
 0x527   :  { %v1030_v12 = vpop.eup %1029 }
 0x528   :  { %v247_v13 = vadd.f32 1.0, %v1030_v12 }
 0x52a   :  { %1031 = vrcp.f32 %v247_v13  ;;  %v259_v19 = vand.u32 2147483648, %v247_v13  ;;  %vm253_vm11 = vweird.f32 %v247_v13  ;;  %v257_v20 = vand.u32 2147483647, %v247_v13 }
 0x52c   :  { %v260_v22 = vor.u32 1.1754944e-38, %v259_v19  ;;  %vm258_vm13 = vcmp.eq.f32.partialorder %v257_v20, 8.507059e+37 }
 0x530   :  { %v1032_v14 = vpop.eup %1031 }
 0x531   :  { %v249_v15 = vmul.f32 %v1032_v14, %v247_v13  ;;  %vm254_vm10 = vweird.f32 %v1032_v14 }
 0x532   :  { %vm255_vm12 = vmor %vm253_vm11, %vm254_vm10 }
 0x533   :  { %v250_v16 = vsub.f32 1.0, %v249_v15 }
 0x535   :  { %v251_v17 = vmul.f32 %v1032_v14, %v250_v16 }
 0x537   :  { %v252_v18 = vadd.f32 %v1032_v14, %v251_v17 }
 0x539   :  { %v256_v21 = vsel %vm255_vm12, %v1032_v14, %v252_v18 }
 0x53a   :  { %v261_v24 = vsel %vm258_vm13, %v260_v22, %v256_v21 }
 0x53b   :  { %v264_v26 = vmul.f32 %v261_v24, %v211_v63 }
 0x580   :  { %v267_v23 = vpop.permute.xlu2 %266 }
 0x581   :  { %v269_v25 = vmul.f32 %v267_v23, %v261_v24 }
 0x583   :  { %271 = vrot.lane.b32.xlu0 %v269_v25, %s1109_s3 }
 0x5f5   :  { %v272_v27 = vpop.permute.xlu0 %271 }
 0x5f6   :  { %v1235_v28 = vadd.f32 %v272_v27, %v264_v26 }
 0x5f8   :  { %1033 = vtanh.f32 %v1235_v28 }
 0x5fe   :  { %v1034_v29 = vpop.eup %1033 }
 0x5ff   :  { %277 = vrot.lane.b32.xlu1 %v1034_v29, %s1108_s2 }
 0x671   :  { %v278_v32 = vpop.permute.xlu1 %277 }
 0x672   :  { %v280_v36 = vmul.f32 %v278_v32, %v261_v24 }
 0x674   :  { %282 = vrot.lane.b32.xlu2 %v280_v36, %s1109_s3 }
 0x6ce   :  { %v283_v7 = vpop.permute.xlu2 %282 }
 0x6cf   :  { %975 = vmatmul.msk.f32.vlgmr.msrb.gmra.mxu1 %vm93_vm5, %v283_v7  ;;  %v409_v7 = vpop.f32.mrf.mxu2 }
 0x6d0   :  { %502 = vmatpush.msrb.mxu1 %v1242_v30 }
 0x6d2   :  { %503 = vmatpush.msrb.mxu1 %v1247_v31 }
 0x6d4   :  { %504 = vmatpush.msrb.mxu1 %v1260_v38 }
 0x6d6   :  { %505 = vmatpush.msrb.mxu1 %v1265_v39 }
 0x6d7   :  { %977 = vmatmul.msk.f32.vlgmr.msra.gmra.mxu1 %vm51_vm0, %v1181_v4 }
 0x6d8   :  { %628 = vmatpush.msra.mxu1 %v1242_v30 }
 0x6da   :  { %629 = vmatpush.msra.mxu1 %v1247_v31 }
 0x6dc   :  { %630 = vmatpush.msra.mxu1 %v1260_v38 }
 0x6de   :  { %631 = vmatpush.msra.mxu1 %v1265_v39 }
 0x74c   :  { %v1300_v33 = vpop.f32.mrf.mxu1 }
 0x754   :  { %v403_v35 = vpop.f32.mrf.mxu1 }
 0x755   :  { %v404_v43 = vadd.f32 %v1305_v34, %v403_v35  ;;  %v410_v35 = vadd.f32 %v1305_v34, %v409_v7 }
 0x757   :  { %v447_v4 = vadd.f32 %v444_v42, %v404_v43 }
 0x759   :  { %1035 = vtanh.f32 %v447_v4  ;;  %v985_v45 = vmul.f32 -1.442695, %v447_v4 }
 0x75b   :  { %1037 = vpow2.f32 %v985_v45 }
 0x75f   :  { %v1036_v44 = vpop.eup %1035 }
 0x760   :  { %470 = vrot.lane.b32.xlu0 %v1036_v44, %s1108_s2 }
 0x761   :  { %v1038_v46 = vpop.eup %1037 }
 0x762   :  { %v451_v47 = vadd.f32 1.0, %v1038_v46 }
 0x764   :  { %1039 = vrcp.f32 %v451_v47  ;;  %v463_v53 = vand.u32 2147483648, %v451_v47  ;;  %vm457_vm15 = vweird.f32 %v451_v47  ;;  %v461_v54 = vand.u32 2147483647, %v451_v47 }
 0x766   :  { %v464_v56 = vor.u32 1.1754944e-38, %v463_v53  ;;  %vm462_vm2 = vcmp.eq.f32.partialorder %v461_v54, 8.507059e+37 }
 0x76a   :  { %v1040_v48 = vpop.eup %1039 }
 0x76b   :  { %v453_v49 = vmul.f32 %v1040_v48, %v451_v47  ;;  %vm458_vm14 = vweird.f32 %v1040_v48 }
 0x76c   :  { %vm459_vm1 = vmor %vm457_vm15, %vm458_vm14 }
 0x76d   :  { %v454_v50 = vsub.f32 1.0, %v453_v49 }
 0x76f   :  { %v455_v51 = vmul.f32 %v1040_v48, %v454_v50 }
 0x771   :  { %v456_v52 = vadd.f32 %v1040_v48, %v455_v51 }
 0x773   :  { %v460_v55 = vsel %vm459_vm1, %v1040_v48, %v456_v52 }
 0x774   :  { %v465_v58 = vsel %vm462_vm2, %v464_v56, %v460_v55 }
 0x775   :  { %v468_v60 = vmul.f32 0.0, %v465_v58 }
 0x7d2   :  { %v471_v57 = vpop.permute.xlu0 %470 }
 0x7d3   :  { %v473_v59 = vmul.f32 %v471_v57, %v465_v58 }
 0x7d5   :  { %475 = vrot.lane.b32.xlu1 %v473_v59, %s1109_s3 }
 0x847   :  { %v476_v61 = vpop.permute.xlu1 %475 }
 0x848   :  { %v478_v62 = vadd.f32 %v476_v61, %v468_v60 }
 0x84a   :  { %1041 = vtanh.f32 %v478_v62 }
 0x850   :  { %v1042_v63 = vpop.eup %1041 }
 0x851   :  { %481 = vrot.lane.b32.xlu2 %v1042_v63, %s1108_s2 }
 0x8ab   :  { %v482_v0 = vpop.permute.xlu2 %481 }
 0x8ac   :  { %v484_v1 = vmul.f32 %v482_v0, %v465_v58 }
 0x8ae   :  { %486 = vrot.lane.b32.xlu0 %v484_v1, %s1109_s3 }
 0x920   :  { %v487_v2 = vpop.permute.xlu0 %486 }
 0x921   :  { %986 = vmatmul.msk.f32.vlgmr.msrb.gmra.mxu1 %vm93_vm5, %v487_v2 }
 0x922   :  { %817 = vmatpush.msrb.mxu1 %v1242_v30 }
 0x924   :  { %818 = vmatpush.msrb.mxu1 %v1247_v31 }
 0x926   :  { %819 = vmatpush.msrb.mxu1 %v1260_v38 }
 0x928   :  { %820 = vmatpush.msrb.mxu1 %v1265_v39 }
 0x99e   :  { %v507_v6 = vpop.f32.mrf.mxu1 }
 0x99f   :  { %v510_v9 = vadd.f32 %v507_v6, %v407_v5 }
 0x9a1   :  { %1043 = vtanh.f32 %v510_v9  ;;  %v987_v11 = vmul.f32 -1.442695, %v510_v9 }
 0x9a3   :  { %1045 = vpow2.f32 %v987_v11 }
 0x9a7   :  { %v1044_v10 = vpop.eup %1043 }
 0x9a8   :  { %533 = vrot.lane.b32.xlu1 %v1044_v10, %s1108_s2 }
 0x9a9   :  { %v1046_v12 = vpop.eup %1045 }
 0x9aa   :  { %v514_v13 = vadd.f32 1.0, %v1046_v12 }
 0x9ac   :  { %1047 = vrcp.f32 %v514_v13  ;;  %v526_v19 = vand.u32 2147483648, %v514_v13  ;;  %vm520_vm4 = vweird.f32 %v514_v13  ;;  %v524_v20 = vand.u32 2147483647, %v514_v13 }
 0x9ae   :  { %v527_v22 = vor.u32 1.1754944e-38, %v526_v19  ;;  %vm525_vm7 = vcmp.eq.f32.partialorder %v524_v20, 8.507059e+37 }
 0x9b2   :  { %v1048_v14 = vpop.eup %1047 }
 0x9b3   :  { %v516_v15 = vmul.f32 %v1048_v14, %v514_v13  ;;  %vm521_vm3 = vweird.f32 %v1048_v14 }
 0x9b4   :  { %vm522_vm6 = vmor %vm520_vm4, %vm521_vm3 }
 0x9b5   :  { %v517_v16 = vsub.f32 1.0, %v516_v15 }
 0x9b7   :  { %v518_v17 = vmul.f32 %v1048_v14, %v517_v16 }
 0x9b9   :  { %v519_v18 = vadd.f32 %v1048_v14, %v518_v17 }
 0x9bb   :  { %v523_v21 = vsel %vm522_vm6, %v1048_v14, %v519_v18 }
 0x9bc   :  { %v528_v24 = vsel %vm525_vm7, %v527_v22, %v523_v21 }
 0x9bd   :  { %v531_v26 = vmul.f32 %v528_v24, %v478_v62  ;;  %v412_v62 = vpop.f32.mrf.mxu2 }
 0x9be   :  { %v413_v63 = vadd.f32 %v1305_v34, %v412_v62 }
 0xa1a   :  { %v534_v23 = vpop.permute.xlu1 %533 }
 0xa1b   :  { %v536_v25 = vmul.f32 %v534_v23, %v528_v24 }
 0xa1d   :  { %538 = vrot.lane.b32.xlu2 %v536_v25, %s1109_s3  ;;  %v348_v25 = vld [vmem:[%s1406_s0 + $0x20] sm:$0xff] }
 0xa1e   :  { %981 = vmatmul.msk.f32.gmra.mxu2 %vm51_vm0, %v348_v25 }
 0xa77   :  { %v539_v27 = vpop.permute.xlu2 %538 }
 0xa78   :  { %v541_v29 = vadd.f32 %v539_v27, %v531_v26 }
 0xa7a   :  { %1049 = vtanh.f32 %v541_v29 }
 0xa80   :  { %v1050_v32 = vpop.eup %1049 }
 0xa81   :  { %544 = vrot.lane.b32.xlu0 %v1050_v32, %s1108_s2 }
 0xaa1   :  { %v415_v32 = vpop.f32.mrf.mxu2 }
 0xaf3   :  { %v545_v36 = vpop.permute.xlu0 %544 }
 0xaf4   :  { %v547_v37 = vmul.f32 %v545_v36, %v528_v24  ;;  %v416_v36 = vadd.f32 %v1305_v34, %v415_v32 }
 0xaf6   :  { %549 = vrot.lane.b32.xlu1 %v547_v37, %s1109_s3 }
 0xb68   :  { %v550_v40 = vpop.permute.xlu1 %549 }
 0xb69   :  { %988 = vmatmul.msk.f32.vlgmr.msra.gmra.mxu3 %vm93_vm5, %v550_v40 }
 0xb6a   :  { %880 = vmatpush.msra.mxu3 %v1242_v30 }
 0xb6c   :  { %881 = vmatpush.msra.mxu3 %v1247_v31 }
 0xb6e   :  { %882 = vmatpush.msra.mxu3 %v1260_v38 }
 0xb70   :  { %883 = vmatpush.msra.mxu3 %v1265_v39 }
 0xbec   :  { %v570_v42 = vpop.f32.mrf.mxu3 }
 0xbed   :  { %v573_v43 = vadd.f32 %v570_v42, %v410_v35 }
 0xbef   :  { %1051 = vtanh.f32 %v573_v43  ;;  %v989_v44 = vmul.f32 -1.442695, %v573_v43 }
 0xbf1   :  { %1053 = vpow2.f32 %v989_v44 }
 0xbf5   :  { %v1052_v4 = vpop.eup %1051 }
 0xbf6   :  { %596 = vrot.lane.b32.xlu2 %v1052_v4, %s1108_s2 }
 0xbf7   :  { %v1054_v45 = vpop.eup %1053 }
 0xbf8   :  { %v577_v46 = vadd.f32 1.0, %v1054_v45 }
 0xbfa   :  { %1055 = vrcp.f32 %v577_v46  ;;  %v589_v39 = vand.u32 2147483648, %v577_v46  ;;  %vm583_vm9 = vweird.f32 %v577_v46  ;;  %v587_v49 = vand.u32 2147483647, %v577_v46 }
 0xbfc   :  { %v590_v51 = vor.u32 1.1754944e-38, %v589_v39  ;;  %vm588_vm11 = vcmp.eq.f32.partialorder %v587_v49, 8.507059e+37 }
 0xc00   :  { %v1056_v30 = vpop.eup %1055 }
 0xc01   :  { %v579_v31 = vmul.f32 %v1056_v30, %v577_v46  ;;  %vm584_vm8 = vweird.f32 %v1056_v30 }
 0xc02   :  { %vm585_vm10 = vmor %vm583_vm9, %vm584_vm8 }
 0xc03   :  { %v580_v47 = vsub.f32 1.0, %v579_v31 }
 0xc05   :  { %v581_v38 = vmul.f32 %v1056_v30, %v580_v47 }
 0xc07   :  { %v582_v48 = vadd.f32 %v1056_v30, %v581_v38 }
 0xc09   :  { %v586_v50 = vsel %vm585_vm10, %v1056_v30, %v582_v48 }
 0xc0a   :  { %v591_v53 = vsel %vm588_vm11, %v590_v51, %v586_v50 }
 0xc0b   :  { %v594_v55 = vmul.f32 %v591_v53, %v541_v29 }
 0xc50   :  { %v597_v52 = vpop.permute.xlu2 %596 }
 0xc51   :  { %v599_v54 = vmul.f32 %v597_v52, %v591_v53 }
 0xc53   :  { %601 = vrot.lane.b32.xlu0 %v599_v54, %s1109_s3 }
 0xcc5   :  { %v602_v56 = vpop.permute.xlu0 %601 }
 0xcc6   :  { %v604_v57 = vadd.f32 %v602_v56, %v594_v55  ;;  %v349_v55 = vld [vmem:[%s1406_s0 + $0x28] sm:$0xff] }
 0xcc7   :  { %982 = vmatmul.msk.f32.gmra.mxu2 %vm51_vm0, %v349_v55  ;;  %v351_v55 = vld [vmem:[%s1406_s0 + $0x38] sm:$0xff] }
 0xcc8   :  { %1057 = vtanh.f32 %v604_v57 }
 0xcce   :  { %v1058_v58 = vpop.eup %1057 }
 0xccf   :  { %607 = vrot.lane.b32.xlu1 %v1058_v58, %s1108_s2 }
 0xd41   :  { %v608_v59 = vpop.permute.xlu1 %607 }
 0xd42   :  { %v610_v60 = vmul.f32 %v608_v59, %v591_v53 }
 0xd44   :  { %612 = vrot.lane.b32.xlu2 %v610_v60, %s1109_s3 }
 0xd4a   :  { %v418_v59 = vpop.f32.mrf.mxu2 }
 0xd4b   :  { %v419_v60 = vadd.f32 %v1305_v34, %v418_v59 }
 0xd9e   :  { %v613_v61 = vpop.permute.xlu2 %612 }
 0xd9f   :  { %990 = vmatmul.msk.f32.vlgmr.msra.gmra.mxu1 %vm93_vm5, %v613_v61 }
 0xe1c   :  { %v633_v0 = vpop.f32.mrf.mxu1 }
 0xe1d   :  { %v636_v1 = vadd.f32 %v633_v0, %v413_v63 }
 0xe1f   :  { %1059 = vtanh.f32 %v636_v1  ;;  %v991_v3 = vmul.f32 -1.442695, %v636_v1 }
 0xe21   :  { %1061 = vpow2.f32 %v991_v3 }
 0xe25   :  { %v1060_v2 = vpop.eup %1059 }
 0xe26   :  { %659 = vrot.lane.b32.xlu0 %v1060_v2, %s1108_s2 }
 0xe27   :  { %v1062_v5 = vpop.eup %1061 }
 0xe28   :  { %v640_v6 = vadd.f32 1.0, %v1062_v5 }
 0xe2a   :  { %1063 = vrcp.f32 %v640_v6  ;;  %v652_v14 = vand.u32 2147483648, %v640_v6  ;;  %vm646_vm13 = vweird.f32 %v640_v6  ;;  %v650_v15 = vand.u32 2147483647, %v640_v6 }
 0xe2c   :  { %v653_v17 = vor.u32 1.1754944e-38, %v652_v14  ;;  %vm651_vm15 = vcmp.eq.f32.partialorder %v650_v15, 8.507059e+37 }
 0xe30   :  { %v1064_v9 = vpop.eup %1063 }
 0xe31   :  { %v642_v10 = vmul.f32 %v1064_v9, %v640_v6  ;;  %vm647_vm12 = vweird.f32 %v1064_v9 }
 0xe32   :  { %vm648_vm14 = vmor %vm646_vm13, %vm647_vm12 }
 0xe33   :  { %v643_v11 = vsub.f32 1.0, %v642_v10 }
 0xe35   :  { %v644_v12 = vmul.f32 %v1064_v9, %v643_v11 }
 0xe37   :  { %v645_v13 = vadd.f32 %v1064_v9, %v644_v12 }
 0xe39   :  { %v649_v16 = vsel %vm648_vm14, %v1064_v9, %v645_v13 }
 0xe3a   :  { %v654_v19 = vsel %vm651_vm15, %v653_v17, %v649_v16 }
 0xe3b   :  { %v657_v21 = vmul.f32 %v654_v19, %v604_v57 }
 0xe98   :  { %v660_v18 = vpop.permute.xlu0 %659 }
 0xe99   :  { %v662_v20 = vmul.f32 %v660_v18, %v654_v19 }
 0xe9b   :  { %664 = vrot.lane.b32.xlu1 %v662_v20, %s1109_s3 }
 0xf0d   :  { %v665_v22 = vpop.permute.xlu1 %664 }
 0xf0e   :  { %v667_v23 = vadd.f32 %v665_v22, %v657_v21  ;;  %v350_v22 = vld [vmem:[%s1406_s0 + $0x30] sm:$0xff] }
 0xf0f   :  { %983 = vmatmul.msk.f32.gmra.mxu2 %vm51_vm0, %v350_v22 }
 0xf10   :  { %1065 = vtanh.f32 %v667_v23 }
 0xf16   :  { %v1066_v24 = vpop.eup %1065 }
 0xf17   :  { %670 = vrot.lane.b32.xlu2 %v1066_v24, %s1108_s2  ;;  %984 = vmatmul.msk.f32.gmra.mxu2 %vm51_vm0, %v351_v55 }
 0xf71   :  { %v671_v26 = vpop.permute.xlu2 %670 }
 0xf72   :  { %v673_v27 = vmul.f32 %v671_v26, %v654_v19 }
 0xf74   :  { %675 = vrot.lane.b32.xlu0 %v673_v27, %s1109_s3 }
 0xf92   :  { %v421_v26 = vpop.f32.mrf.mxu2 }
 0xf93   :  { %v422_v27 = vadd.f32 %v1305_v34, %v421_v26 }
 0xfe6   :  { %v676_v29 = vpop.permute.xlu0 %675 }
 0xfe7   :  { %992 = vmatmul.msk.f32.vlgmr.msrb.gmra.mxu3 %vm93_vm5, %v676_v29 }
0x106a   :  { %v696_v37 = vpop.f32.mrf.mxu3 }
0x106b   :  { %v699_v40 = vadd.f32 %v696_v37, %v416_v36 }
0x106d   :  { %1067 = vtanh.f32 %v699_v40  ;;  %v993_v35 = vmul.f32 -1.442695, %v699_v40 }
0x106f   :  { %1069 = vpow2.f32 %v993_v35 }
0x1073   :  { %v1068_v7 = vpop.eup %1067 }
0x1074   :  { %722 = vrot.lane.b32.xlu1 %v1068_v7, %s1108_s2 }
0x1075   :  { %v1070_v42 = vpop.eup %1069 }
0x1076   :  { %v703_v43 = vadd.f32 1.0, %v1070_v42 }
0x1078   :  { %1071 = vrcp.f32 %v703_v43  ;;  %v715_v31 = vand.u32 2147483648, %v703_v43  ;;  %vm709_vm2 = vweird.f32 %v703_v43  ;;  %v713_v47 = vand.u32 2147483647, %v703_v43 }
0x107a   :  { %v716_v48 = vor.u32 1.1754944e-38, %v715_v31  ;;  %vm714_vm4 = vcmp.eq.f32.partialorder %v713_v47, 8.507059e+37  ;;  %v91_v31 = vadd.f32 %v1195_v8, %v1224_v41 }
0x107e   :  { %v1072_v4 = vpop.eup %1071 }
0x107f   :  { %v705_v44 = vmul.f32 %v1072_v4, %v703_v43  ;;  %vm710_vm1 = vweird.f32 %v1072_v4 }
0x1080   :  { %vm711_vm3 = vmor %vm709_vm2, %vm710_vm1 }
0x1081   :  { %v706_v45 = vsub.f32 1.0, %v705_v44 }
0x1083   :  { %v707_v46 = vmul.f32 %v1072_v4, %v706_v45 }
0x1085   :  { %v708_v30 = vadd.f32 %v1072_v4, %v707_v46 }
0x1087   :  { %v712_v38 = vsel %vm711_vm3, %v1072_v4, %v708_v30 }
0x1088   :  { %v717_v49 = vsel %vm714_vm4, %v716_v48, %v712_v38  ;;  %v306_v38 = vadd.f32 %v1300_v33, %v91_v31 }
0x1089   :  { %v720_v51 = vmul.f32 %v717_v49, %v667_v23 }
0x108a   :  { %v976_v41 = vmul.f32 -1.442695, %v306_v38 }
0x10e6   :  { %v723_v39 = vpop.permute.xlu1 %722 }
0x10e7   :  { %v725_v50 = vmul.f32 %v723_v39, %v717_v49 }
0x10e9   :  { %727 = vrot.lane.b32.xlu2 %v725_v50, %s1109_s3 }
0x1143   :  { %v728_v52 = vpop.permute.xlu2 %727 }
0x1144   :  { %v730_v53 = vadd.f32 %v728_v52, %v720_v51 }
0x1146   :  { %1073 = vtanh.f32 %v730_v53 }
0x114c   :  { %v1074_v54 = vpop.eup %1073 }
0x114d   :  { %733 = vrot.lane.b32.xlu0 %v1074_v54, %s1108_s2 }
0x11bf   :  { %v734_v56 = vpop.permute.xlu0 %733 }
0x11c0   :  { %v736_v57 = vmul.f32 %v734_v56, %v717_v49 }
0x11c2   :  { %738 = vrot.lane.b32.xlu1 %v736_v57, %s1109_s3 }
0x1234   :  { %v739_v58 = vpop.permute.xlu1 %738 }
0x1235   :  { %994 = vmatmul.msk.f32.vlgmr.msra.gmra.mxu0 %vm93_vm5, %v739_v58 }
0x12b2   :  { %v759_v61 = vpop.f32.mrf.mxu0 }
0x12b3   :  { %v762_v62 = vadd.f32 %v759_v61, %v419_v60 }
0x12b5   :  { %1075 = vtanh.f32 %v762_v62  ;;  %v995_v0 = vmul.f32 -1.442695, %v762_v62 }
0x12b7   :  { %1077 = vpow2.f32 %v995_v0 }
0x12bb   :  { %v1076_v63 = vpop.eup %1075 }
0x12bc   :  { %785 = vrot.lane.b32.xlu2 %v1076_v63, %s1108_s2 }
0x12bd   :  { %v1078_v1 = vpop.eup %1077 }
0x12be   :  { %v766_v2 = vadd.f32 1.0, %v1078_v1 }
0x12c0   :  { %1079 = vrcp.f32 %v766_v2  ;;  %v778_v11 = vand.u32 2147483648, %v766_v2  ;;  %vm772_vm7 = vweird.f32 %v766_v2  ;;  %v776_v12 = vand.u32 2147483647, %v766_v2 }
0x12c2   :  { %v779_v14 = vor.u32 1.1754944e-38, %v778_v11  ;;  %vm777_vm9 = vcmp.eq.f32.partialorder %v776_v12, 8.507059e+37 }
0x12c6   :  { %v1080_v3 = vpop.eup %1079 }
0x12c7   :  { %v768_v5 = vmul.f32 %v1080_v3, %v766_v2  ;;  %vm773_vm6 = vweird.f32 %v1080_v3 }
0x12c8   :  { %vm774_vm8 = vmor %vm772_vm7, %vm773_vm6  ;;  %vm960_vm7 = vcmask 7168  }
0x12c9   :  { %v769_v6 = vsub.f32 1.0, %v768_v5 }
0x12cb   :  { %v770_v9 = vmul.f32 %v1080_v3, %v769_v6 }
0x12cd   :  { %v771_v10 = vadd.f32 %v1080_v3, %v770_v9 }
0x12cf   :  { %v775_v13 = vsel %vm774_vm8, %v1080_v3, %v771_v10  ;;  %v424_v10 = vpop.f32.mrf.mxu2 }
0x12d0   :  { %v780_v16 = vsel %vm777_vm9, %v779_v14, %v775_v13  ;;  %v425_v11 = vadd.f32 %v1305_v34, %v424_v10 }
0x12d1   :  { %v783_v18 = vmul.f32 %v780_v16, %v730_v53 }
0x1316   :  { %v786_v15 = vpop.permute.xlu2 %785 }
0x1317   :  { %v788_v17 = vmul.f32 %v786_v15, %v780_v16 }
0x1319   :  { %790 = vrot.lane.b32.xlu0 %v788_v17, %s1109_s3 }
0x138b   :  { %v791_v19 = vpop.permute.xlu0 %790 }
0x138c   :  { %v793_v20 = vadd.f32 %v791_v19, %v783_v18 }
0x138e   :  { %1081 = vtanh.f32 %v793_v20 }
0x1394   :  { %v1082_v21 = vpop.eup %1081 }
0x1395   :  { %796 = vrot.lane.b32.xlu1 %v1082_v21, %s1108_s2 }
0x1407   :  { %v797_v23 = vpop.permute.xlu1 %796 }
0x1408   :  { %v799_v24 = vmul.f32 %v797_v23, %v780_v16 }
0x140a   :  { %801 = vrot.lane.b32.xlu2 %v799_v24, %s1109_s3 }
0x1464   :  { %v802_v25 = vpop.permute.xlu2 %801 }
0x1465   :  { %996 = vmatmul.msk.f32.vlgmr.msrb.gmra.mxu1 %vm93_vm5, %v802_v25 }
0x14e2   :  { %v822_v29 = vpop.f32.mrf.mxu1 }
0x14e3   :  { %v825_v32 = vadd.f32 %v822_v29, %v422_v27 }
0x14e5   :  { %1083 = vtanh.f32 %v825_v32  ;;  %v997_v37 = vmul.f32 -1.442695, %v825_v32 }
0x14e7   :  { %1085 = vpow2.f32 %v997_v37 }
0x14eb   :  { %v1084_v36 = vpop.eup %1083 }
0x14ec   :  { %848 = vrot.lane.b32.xlu0 %v1084_v36, %s1108_s2 }
0x14ed   :  { %v1086_v40 = vpop.eup %1085 }
0x14ee   :  { %v829_v7 = vadd.f32 1.0, %v1086_v40  ;;  %v1008_v40 = vld [vmem:[%s1411_s7] ss:$0 sm:$0xff] }
0x14f0   :  { %1087 = vrcp.f32 %v829_v7  ;;  %v841_v45 = vand.u32 2147483648, %v829_v7  ;;  %vm835_vm11 = vweird.f32 %v829_v7  ;;  %v839_v46 = vand.u32 2147483647, %v829_v7 }
0x14f1   :  { %1089 = vtanh.f32 %v306_v38 }
0x14f2   :  { %v842_v47 = vor.u32 1.1754944e-38, %v841_v45  ;;  %vm840_vm13 = vcmp.eq.f32.partialorder %v839_v46, 8.507059e+37 }
0x14f6   :  { %v1088_v35 = vpop.eup %1087 }
0x14f7   :  { %v831_v42 = vmul.f32 %v1088_v35, %v829_v7  ;;  %vm836_vm10 = vweird.f32 %v1088_v35  ;;  %v1090_v50 = vpop.eup %1089  ;;  %v1009_v7 = vld [vmem:[%s1412_s8] ss:$0 sm:$0xff] }
0x14f8   :  { %vm837_vm12 = vmor %vm835_vm11, %vm836_vm10 }
0x14f9   :  { %v832_v43 = vsub.f32 1.0, %v831_v42 }
0x14fb   :  { %v833_v4 = vmul.f32 %v1088_v35, %v832_v43 }
0x14fd   :  { %v834_v44 = vadd.f32 %v1088_v35, %v833_v4 }
0x14ff   :  { %v838_v30 = vsel %vm837_vm12, %v1088_v35, %v834_v44 }
0x1500   :  { %v843_v39 = vsel %vm840_vm13, %v842_v47, %v838_v30 }
0x1501   :  { %v846_v51 = vmul.f32 %v843_v39, %v793_v20 }
0x155e   :  { %v849_v48 = vpop.permute.xlu0 %848 }
0x155f   :  { %v851_v49 = vmul.f32 %v849_v48, %v843_v39 }
0x1561   :  { %853 = vrot.lane.b32.xlu1 %v851_v49, %s1109_s3 }
0x1569   :  { %329 = vrot.lane.b32.xlu1 %v1090_v50, %s1108_s2  ;;  %v15_v50 = vstv %s1413_s9 }
0x156a   :  { %16 = vst [vmem:[#allocation2] sm:$0x1] %v15_v50 }
0x15d3   :  { %v854_v52 = vpop.permute.xlu1 %853 }
0x15d4   :  { %v1370_v53 = vadd.f32 %v854_v52, %v846_v51 }
0x15d6   :  { %1091 = vtanh.f32 %v1370_v53 }
0x15d7   :  { %1093 = vpow2.f32 %v976_v41 }
0x15db   :  { %v330_v2 = vpop.permute.xlu1 %329 }
0x15dc   :  { %v1092_v8 = vpop.eup %1091 }
0x15dd   :  { %859 = vrot.lane.b32.xlu2 %v1092_v8, %s1108_s2  ;;  %v1094_v33 = vpop.eup %1093 }
0x15de   :  { %v310_v54 = vadd.f32 1.0, %v1094_v33 }
0x15e0   :  { %1095 = vrcp.f32 %v310_v54  ;;  %v322_v63 = vand.u32 2147483648, %v310_v54  ;;  %vm316_vm15 = vweird.f32 %v310_v54  ;;  %v320_v0 = vand.u32 2147483647, %v310_v54 }
0x15e2   :  { %v323_v3 = vor.u32 1.1754944e-38, %v322_v63  ;;  %vm321_vm2 = vcmp.eq.f32.partialorder %v320_v0, 8.507059e+37 }
0x15e6   :  { %v1096_v56 = vpop.eup %1095 }
0x15e7   :  { %v312_v57 = vmul.f32 %v1096_v56, %v310_v54  ;;  %vm317_vm14 = vweird.f32 %v1096_v56 }
0x15e8   :  { %vm318_vm1 = vmor %vm316_vm15, %vm317_vm14 }
0x15e9   :  { %v313_v58 = vsub.f32 1.0, %v312_v57 }
0x15eb   :  { %v314_v59 = vmul.f32 %v1096_v56, %v313_v58 }
0x15ed   :  { %v315_v61 = vadd.f32 %v1096_v56, %v314_v59 }
0x15ef   :  { %v319_v1 = vsel %vm318_vm1, %v1096_v56, %v315_v61 }
0x15f0   :  { %v324_v5 = vsel %vm321_vm2, %v323_v3, %v319_v1 }
0x15f1   :  { %v332_v6 = vmul.f32 %v330_v2, %v324_v5  ;;  %v327_v15 = vmul.f32 %v324_v5, %v1235_v28 }
0x1637   :  { %v860_v60 = vpop.permute.xlu2 %859 }
0x1638   :  { %v862_v62 = vmul.f32 %v860_v60, %v843_v39 }
0x163a   :  { %864 = vrot.lane.b32.xlu0 %v862_v62, %s1109_s3 }
0x1642   :  { %334 = vrot.lane.b32.xlu0 %v332_v6, %s1109_s3 }
0x16ac   :  { %v865_v9 = vpop.permute.xlu0 %864 }
0x16ad   :  { %998 = vmatmul.msk.f32.vlgmr.msra.gmra.mxu3 %vm93_vm5, %v865_v9 }
0x16b4   :  { %v335_v14 = vpop.permute.xlu0 %334 }
0x16b5   :  { %v337_v16 = vadd.f32 %v335_v14, %v327_v15 }
0x1730   :  { %v885_v12 = vpop.f32.mrf.mxu3 }
0x1731   :  { %v888_v13 = vadd.f32 %v885_v12, %v425_v11 }
0x1733   :  { %1097 = vtanh.f32 %v888_v13  ;;  %v999_v19 = vmul.f32 -1.442695, %v888_v13 }
0x1734   :  { %1099 = vtanh.f32 %v337_v16 }
0x1735   :  { %1101 = vpow2.f32 %v999_v19 }
0x1739   :  { %v1098_v17 = vpop.eup %1097 }
0x173a   :  { %911 = vrot.lane.b32.xlu2 %v1098_v17, %s1108_s2  ;;  %v1100_v18 = vpop.eup %1099 }
0x173b   :  { %v1102_v20 = vpop.eup %1101 }
0x173c   :  { %v892_v21 = vadd.f32 1.0, %v1102_v20 }
0x173e   :  { %1103 = vrcp.f32 %v892_v21  ;;  %v904_v28 = vand.u32 2147483648, %v892_v21  ;;  %vm898_vm3 = vweird.f32 %v892_v21  ;;  %v902_v26 = vand.u32 2147483647, %v892_v21 }
0x1740   :  { %v905_v29 = vor.u32 1.1754944e-38, %v904_v28  ;;  %vm903_vm6 = vcmp.eq.f32.partialorder %v902_v26, 8.507059e+37 }
0x1742   :  { %340 = vrot.lane.b32.xlu2 %v1100_v18, %s1108_s2 }
0x1744   :  { %v1104_v34 = vpop.eup %1103 }
0x1745   :  { %v894_v22 = vmul.f32 %v1104_v34, %v892_v21  ;;  %vm899_vm0 = vweird.f32 %v1104_v34 }
0x1746   :  { %vm900_vm4 = vmor %vm898_vm3, %vm899_vm0 }
0x1747   :  { %v895_v23 = vsub.f32 1.0, %v894_v22 }
0x1749   :  { %v896_v24 = vmul.f32 %v1104_v34, %v895_v23 }
0x174a   :  { %943 = vrot.lane.b32.xlu2 %v1009_v7, %s1110_s13 }
0x174b   :  { %v897_v25 = vadd.f32 %v1104_v34, %v896_v24 }
0x174d   :  { %v901_v27 = vsel %vm900_vm4, %v1104_v34, %v897_v25 }
0x174e   :  { %v906_v36 = vsel %vm903_vm6, %v905_v29, %v901_v27 }
0x174f   :  { %v909_v35 = vmul.f32 %v906_v36, %v1370_v53  ;;  %v1010_v53 = vld [vmem:[#allocation2] ss:$0 sm:$0xff] }
0x1794   :  { %v912_v32 = vpop.permute.xlu2 %911 }
0x1795   :  { %v914_v37 = vmul.f32 %v912_v32, %v906_v36 }
0x1797   :  { %916 = vrot.lane.b32.xlu1 %v914_v37, %s1109_s3 }
0x179c   :  { %v341_v44 = vpop.permute.xlu2 %340 }
0x179d   :  { %v343_v46 = vmul.f32 %v341_v44, %v324_v5 }
0x179f   :  { %929 = vrot.lane.b32.xlu1 %v1008_v40, %s1110_s13 }
0x17a4   :  { %v944_v47 = vpop.permute.xlu2 %943 }
0x1809   :  { %v917_v42 = vpop.permute.xlu1 %916 }
0x180a   :  { %v919_v43 = vadd.f32 %v917_v42, %v909_v35 }
0x180c   :  { %1105 = vtanh.f32 %v919_v43 }
0x1811   :  { %v930_v45 = vpop.permute.xlu1 %929 }
0x1812   :  { %v1106_v4 = vpop.eup %1105  ;;  %v932_v30 = vmul.f32 %v930_v45, %v343_v46 }
0x1813   :  { %922 = vrot.lane.b32.xlu0 %v1106_v4, %s1108_s2 }
0x181b   :  { %934 = vrot.lane.b32.xlu0 %v932_v30, %s1109_s3 }
0x1885   :  { %v923_v31 = vpop.permute.xlu0 %922 }
0x1886   :  { %v925_v38 = vmul.f32 %v923_v31, %v906_v36 }
0x1888   :  { %v946_v48 = vmul.f32 %v944_v47, %v925_v38 }
0x188a   :  { %948 = vrot.lane.b32.xlu1 %v946_v48, %s1109_s3 }
0x188d   :  { %v935_v39 = vpop.permute.xlu0 %934 }
0x188e   :  { %v937_v49 = vsel %vm93_vm5, %v935_v39, 0.0 }
0x188f   :  { %938 = vadd.xlane.f32.xlu2 %v937_v49 }
0x18fc   :  { %v949_v51 = vpop.permute.xlu1 %948 }
0x18fd   :  { %v951_v52 = vsel %vm93_vm5, %v949_v51, 0.0 }
0x18fe   :  { %952 = vadd.xlane.f32.xlu0 %v951_v52 }
0x1902   :  { %v939_v8 = vpop.xlane.xlu2 %938 }
0x1971   :  { %v953_v41 = vpop.xlane.xlu0 %952 }
0x1972   :  { %v954_v33 = vadd.f32 %v953_v41, %v939_v8 }
0x1974   :  { %v959_v54 = vadd.f32 %v1010_v53, %v954_v33 }
0x1976   :  { %961 = vst.msk [vmem:[%s1414_s10] sm:$0xff] %vm960_vm7, %v959_v54 }

</bundles_post_ra>
